<compile_context>
chip_gen: v7x
topology: tpu7x:2x2x1
jax: 0.10.0
libtpu: 0.0.40
codegen_flags: <defaults>
</compile_context>

<pallas_src>
import jax
import jax.numpy as jnp
from jax import lax
from jax.experimental import pallas as pl
from jax.experimental.pallas import tpu as pltpu


def _round_up(x, m):
    return (x + m - 1) // m * m


def lstm_recurrence_kernel(gx_ref, whh_ref, out_ref, cn_ref):
    """Serial LSTM recurrence.

    gx_ref : (T, BP, 4*HP) precomputed x-projection + bias (gate-padded).
    whh_ref: (HP, 4*HP)    recurrent weights (gate-padded).
    out_ref: (T, BP, HP)   hidden state at every step (padded).
    cn_ref : (BP, HP)      final cell state (padded).
    """
    seq_len, bp, hp = out_ref.shape

    def step(t, carry):
        h, c = carry
        # Only the recurrent dot + gate nonlinearities remain per step.
        gates = jnp.dot(h, whh_ref[...],
                        preferred_element_type=jnp.float32) + gx_ref[t]
        i = jax.nn.sigmoid(gates[:, 0 * hp:1 * hp])   # 128-lane aligned slices
        f = jax.nn.sigmoid(gates[:, 1 * hp:2 * hp])
        g = jnp.tanh(gates[:, 2 * hp:3 * hp])
        o = jax.nn.sigmoid(gates[:, 3 * hp:4 * hp])
        c_new = f * c + i * g
        h_new = o * jnp.tanh(c_new)
        out_ref[t] = h_new.astype(out_ref.dtype)
        return (h_new, c_new)

    h0 = jnp.zeros((bp, hp), jnp.float32)
    c0 = jnp.zeros((bp, hp), jnp.float32)
    _, c_fin = lax.fori_loop(0, seq_len, step, (h0, c0), unroll=True)
    cn_ref[...] = c_fin.astype(cn_ref.dtype)


def lstm_encoder_forward(x, w_ih, w_hh, b_ih, b_hh):
    """x: (seq_len, batch, input_size). Returns (lstm_out, (h_n, c_n)).

    Matches torch.nn.LSTM(input_size, hidden_size, num_layers=1) with zero
    initial state: lstm_out is (T, B, H); h_n, c_n are (1, B, H).
    """
    seq_len, batch, din = x.shape
    hidden = w_hh.shape[1]
    hp = _round_up(hidden, 128)   # per-gate lane padding
    bp = _round_up(batch, 8)      # sublane padding

    x = jnp.asarray(x, jnp.float32)
    wih_t = jnp.asarray(w_ih, jnp.float32).T          # (Din, 4H)
    whh_t = jnp.asarray(w_hh, jnp.float32).T          # (H, 4H)
    bias = jnp.asarray(b_ih, jnp.float32) + jnp.asarray(b_hh, jnp.float32)

    # Hoisted input projection + bias: one matmul over the whole sequence.
    gx = x.reshape(seq_len * batch, din) @ wih_t + bias[None, :]   # (T*B, 4H)
    gx = gx.reshape(seq_len, batch, 4, hidden)
    gx_pad = jnp.zeros((seq_len, bp, 4, hp), jnp.float32)
    gx_pad = gx_pad.at[:, :batch, :, :hidden].set(gx)
    gx_pad = gx_pad.reshape(seq_len, bp, 4 * hp)

    # Gate-padded recurrent weights: rows H:HP and per-gate cols H:HP are zero.
    whh_r = whh_t.reshape(hidden, 4, hidden)
    whh_pad = jnp.zeros((hp, 4, hp), jnp.float32)
    whh_pad = whh_pad.at[:hidden, :, :hidden].set(whh_r)
    whh_pad = whh_pad.reshape(hp, 4 * hp)

    out_shapes = (
        jax.ShapeDtypeStruct((seq_len, bp, hp), jnp.float32),   # all hidden states
        jax.ShapeDtypeStruct((bp, hp), jnp.float32),            # final cell state
    )

    grid_spec = pltpu.PrefetchScalarGridSpec(
        num_scalar_prefetch=0,
        grid=(1,),
        in_specs=[
            pl.BlockSpec((seq_len, bp, 4 * hp), lambda i: (0, 0, 0)),
            pl.BlockSpec((hp, 4 * hp), lambda i: (0, 0)),
        ],
        out_specs=[
            pl.BlockSpec((seq_len, bp, hp), lambda i: (0, 0, 0)),
            pl.BlockSpec((bp, hp), lambda i: (0, 0)),
        ],
    )

    out_pad, cn_pad = pl.pallas_call(
        lstm_recurrence_kernel,
        out_shape=out_shapes,
        grid_spec=grid_spec,
        compiler_params=pltpu.CompilerParams(
            dimension_semantics=("arbitrary",)),
    )(gx_pad, whh_pad)

    lstm_out = out_pad[:, :batch, :hidden]           # (T, B, H)
    c_n = cn_pad[:batch, :hidden][None, :, :]        # (1, B, H)
    h_n = lstm_out[-1][None, :, :]                   # (1, B, H) == last hidden
    return lstm_out, (h_n, c_n)


def lstm_ref(x, w_ih, w_hh, b_ih, b_hh):
    """Pure-JAX reference mirroring torch.nn.LSTM (single layer)."""
    seq_len, batch, _ = x.shape
    hidden = w_hh.shape[1]
    h = jnp.zeros((batch, hidden), jnp.float32)
    c = jnp.zeros((batch, hidden), jnp.float32)
    outs = []
    for t in range(seq_len):
        gates = x[t] @ w_ih.T + h @ w_hh.T + b_ih + b_hh
        i = jax.nn.sigmoid(gates[:, 0 * hidden:1 * hidden])
        f = jax.nn.sigmoid(gates[:, 1 * hidden:2 * hidden])
        g = jnp.tanh(gates[:, 2 * hidden:3 * hidden])
        o = jax.nn.sigmoid(gates[:, 3 * hidden:4 * hidden])
        c = f * c + i * g
        h = o * jnp.tanh(c)
        outs.append(h)
    return jnp.stack(outs, axis=0), h, c


if __name__ == "__main__":
    input_size, hidden_size, num_layers = 1, 64, 1
    seq_len, batch = 8, 4

    key = jax.random.PRNGKey(0)
    k0, k1, k2, k3, k4 = jax.random.split(key, 5)
    bound = 1.0 / float(jnp.sqrt(hidden_size))

    x = jax.random.normal(k0, (seq_len, batch, input_size), jnp.float32)
    w_ih = jax.random.uniform(k1, (4 * hidden_size, input_size), jnp.float32,
                              -bound, bound)
    w_hh = jax.random.uniform(k2, (4 * hidden_size, hidden_size), jnp.float32,
                              -bound, bound)
    b_ih = jax.random.uniform(k3, (4 * hidden_size,), jnp.float32, -bound, bound)
    b_hh = jax.random.uniform(k4, (4 * hidden_size,), jnp.float32, -bound, bound)

    lstm_out, (h_n, c_n) = lstm_encoder_forward(x, w_ih, w_hh, b_ih, b_hh)
    jax.block_until_ready((lstm_out, h_n, c_n))

    ref_out, ref_h, ref_c = lstm_ref(x, w_ih, w_hh, b_ih, b_hh)
    assert lstm_out.shape == (seq_len, batch, hidden_size)
    assert h_n.shape == (num_layers, batch, hidden_size)
    assert c_n.shape == (num_layers, batch, hidden_size)
    assert jnp.allclose(lstm_out, ref_out, atol=1e-3, rtol=1e-3)
    assert jnp.allclose(h_n[0], ref_h, atol=1e-3, rtol=1e-3)
    assert jnp.allclose(c_n[0], ref_c, atol=1e-3, rtol=1e-3)

    print("KERNEL_OK")
</pallas_src>

<mosaic_0001>
module attributes {stable_mosaic.version = 11 : i64} {
  func.func @lstm_recurrence_kernel(%arg0: i32, %arg1: memref<8x8x512xf32, #tpu.memory_space<vmem>>, %arg2: memref<128x512xf32, #tpu.memory_space<vmem>>, %arg3: memref<8x8x128xf32, #tpu.memory_space<vmem>>, %arg4: memref<8x128xf32, #tpu.memory_space<vmem>>) attributes {dimension_semantics = [#tpu.dimension_semantics<arbitrary>], iteration_bounds = array<i64: 1>, scalar_prefetch = 0 : i64, scratch_operands = 0 : i64, tpu.core_type = #tpu.core_type<tc>, window_params = [{pipeline_mode = #tpu.pipeline_mode<synchronous>, transform_indices = @transform_0, window_bounds = array<i64: 8, 8, 512>}, {pipeline_mode = #tpu.pipeline_mode<synchronous>, transform_indices = @transform_1, window_bounds = array<i64: 128, 512>}, {pipeline_mode = #tpu.pipeline_mode<synchronous>, transform_indices = @transform_2, window_bounds = array<i64: 8, 8, 128>}, {pipeline_mode = #tpu.pipeline_mode<synchronous>, transform_indices = @transform_3, window_bounds = array<i64: 8, 128>}]} {
    %cst = arith.constant 0.000000e+00 : f32
    %0 = vector.broadcast %cst : f32 to vector<8x128xf32>
    %cst_0 = arith.constant 0.000000e+00 : f32
    %1 = vector.broadcast %cst_0 : f32 to vector<8x128xf32>
    %c0_i32 = arith.constant 0 : i32
    %c0 = arith.constant 0 : index
    %c0_1 = arith.constant 0 : index
    %2 = vector.load %arg2[%c0, %c0_1] : memref<128x512xf32, #tpu.memory_space<vmem>>, vector<128x512xf32>
    %cst_2 = arith.constant dense<0.000000e+00> : vector<8x512xf32>
    %3 = tpu.matmul %0, %2, %cst_2 {dimension_numbers = #tpu.dot_dimension_numbers<[1], [0], [0], [1], [0, 0, 1, 1], [], []>} : vector<8x128xf32>, vector<128x512xf32>, vector<8x512xf32> -> vector<8x512xf32>
    %4 = arith.index_cast %c0_i32 : i32 to index
    %c0_3 = arith.constant 0 : index
    %c0_4 = arith.constant 0 : index
    %5 = vector.load %arg1[%4, %c0_3, %c0_4] : memref<8x8x512xf32, #tpu.memory_space<vmem>>, vector<1x8x512xf32>
    %6 = vector.shape_cast %5 : vector<1x8x512xf32> to vector<8x512xf32>
    %7 = arith.addf %3, %6 : vector<8x512xf32>
    %8 = vector.extract_strided_slice %7 {offsets = [0, 0], sizes = [8, 128], strides = [1, 1]} : vector<8x512xf32> to vector<8x128xf32>
    %9 = arith.negf %8 : vector<8x128xf32>
    %10 = math.exp %9 : vector<8x128xf32>
    %cst_5 = arith.constant 1.000000e+00 : f32
    %11 = vector.broadcast %cst_5 : f32 to vector<8x128xf32>
    %12 = arith.addf %11, %10 : vector<8x128xf32>
    %13 = arith.divf %11, %12 : vector<8x128xf32>
    %14 = vector.extract_strided_slice %7 {offsets = [0, 128], sizes = [8, 128], strides = [1, 1]} : vector<8x512xf32> to vector<8x128xf32>
    %15 = arith.negf %14 : vector<8x128xf32>
    %16 = math.exp %15 : vector<8x128xf32>
    %cst_6 = arith.constant 1.000000e+00 : f32
    %17 = vector.broadcast %cst_6 : f32 to vector<8x128xf32>
    %18 = arith.addf %17, %16 : vector<8x128xf32>
    %19 = arith.divf %17, %18 : vector<8x128xf32>
    %20 = vector.extract_strided_slice %7 {offsets = [0, 256], sizes = [8, 128], strides = [1, 1]} : vector<8x512xf32> to vector<8x128xf32>
    %21 = math.tanh %20 : vector<8x128xf32>
    %22 = vector.extract_strided_slice %7 {offsets = [0, 384], sizes = [8, 128], strides = [1, 1]} : vector<8x512xf32> to vector<8x128xf32>
    %23 = arith.negf %22 : vector<8x128xf32>
    %24 = math.exp %23 : vector<8x128xf32>
    %cst_7 = arith.constant 1.000000e+00 : f32
    %25 = vector.broadcast %cst_7 : f32 to vector<8x128xf32>
    %26 = arith.addf %25, %24 : vector<8x128xf32>
    %27 = arith.divf %25, %26 : vector<8x128xf32>
    %28 = arith.mulf %19, %1 : vector<8x128xf32>
    %29 = arith.mulf %13, %21 : vector<8x128xf32>
    %30 = arith.addf %28, %29 : vector<8x128xf32>
    %31 = math.tanh %30 : vector<8x128xf32>
    %32 = arith.mulf %27, %31 : vector<8x128xf32>
    %33 = arith.index_cast %c0_i32 : i32 to index
    %c0_8 = arith.constant 0 : index
    %c0_9 = arith.constant 0 : index
    %34 = vector.load %arg3[%33, %c0_8, %c0_9] : memref<8x8x128xf32, #tpu.memory_space<vmem>>, vector<1x8x128xf32>
    %35 = vector.shape_cast %34 : vector<1x8x128xf32> to vector<8x128xf32>
    %36 = vector.shape_cast %32 : vector<8x128xf32> to vector<1x8x128xf32>
    tpu.vector_store %arg3[%33, %c0_8, %c0_9], %36 {strides = array<i32>} : memref<8x8x128xf32, #tpu.memory_space<vmem>>, vector<1x8x128xf32>,
    %c1_i32 = arith.constant 1 : i32
    %c0_10 = arith.constant 0 : index
    %c0_11 = arith.constant 0 : index
    %37 = vector.load %arg2[%c0_10, %c0_11] : memref<128x512xf32, #tpu.memory_space<vmem>>, vector<128x512xf32>
    %cst_12 = arith.constant dense<0.000000e+00> : vector<8x512xf32>
    %38 = tpu.matmul %32, %37, %cst_12 {dimension_numbers = #tpu.dot_dimension_numbers<[1], [0], [0], [1], [0, 0, 1, 1], [], []>} : vector<8x128xf32>, vector<128x512xf32>, vector<8x512xf32> -> vector<8x512xf32>
    %39 = arith.index_cast %c1_i32 : i32 to index
    %c0_13 = arith.constant 0 : index
    %c0_14 = arith.constant 0 : index
    %40 = vector.load %arg1[%39, %c0_13, %c0_14] : memref<8x8x512xf32, #tpu.memory_space<vmem>>, vector<1x8x512xf32>
    %41 = vector.shape_cast %40 : vector<1x8x512xf32> to vector<8x512xf32>
    %42 = arith.addf %38, %41 : vector<8x512xf32>
    %43 = vector.extract_strided_slice %42 {offsets = [0, 0], sizes = [8, 128], strides = [1, 1]} : vector<8x512xf32> to vector<8x128xf32>
    %44 = arith.negf %43 : vector<8x128xf32>
    %45 = math.exp %44 : vector<8x128xf32>
    %cst_15 = arith.constant 1.000000e+00 : f32
    %46 = vector.broadcast %cst_15 : f32 to vector<8x128xf32>
    %47 = arith.addf %46, %45 : vector<8x128xf32>
    %48 = arith.divf %46, %47 : vector<8x128xf32>
    %49 = vector.extract_strided_slice %42 {offsets = [0, 128], sizes = [8, 128], strides = [1, 1]} : vector<8x512xf32> to vector<8x128xf32>
    %50 = arith.negf %49 : vector<8x128xf32>
    %51 = math.exp %50 : vector<8x128xf32>
    %cst_16 = arith.constant 1.000000e+00 : f32
    %52 = vector.broadcast %cst_16 : f32 to vector<8x128xf32>
    %53 = arith.addf %52, %51 : vector<8x128xf32>
    %54 = arith.divf %52, %53 : vector<8x128xf32>
    %55 = vector.extract_strided_slice %42 {offsets = [0, 256], sizes = [8, 128], strides = [1, 1]} : vector<8x512xf32> to vector<8x128xf32>
    %56 = math.tanh %55 : vector<8x128xf32>
    %57 = vector.extract_strided_slice %42 {offsets = [0, 384], sizes = [8, 128], strides = [1, 1]} : vector<8x512xf32> to vector<8x128xf32>
    %58 = arith.negf %57 : vector<8x128xf32>
    %59 = math.exp %58 : vector<8x128xf32>
    %cst_17 = arith.constant 1.000000e+00 : f32
    %60 = vector.broadcast %cst_17 : f32 to vector<8x128xf32>
    %61 = arith.addf %60, %59 : vector<8x128xf32>
    %62 = arith.divf %60, %61 : vector<8x128xf32>
    %63 = arith.mulf %54, %30 : vector<8x128xf32>
    %64 = arith.mulf %48, %56 : vector<8x128xf32>
    %65 = arith.addf %63, %64 : vector<8x128xf32>
    %66 = math.tanh %65 : vector<8x128xf32>
    %67 = arith.mulf %62, %66 : vector<8x128xf32>
    %68 = arith.index_cast %c1_i32 : i32 to index
    %c0_18 = arith.constant 0 : index
    %c0_19 = arith.constant 0 : index
    %69 = vector.load %arg3[%68, %c0_18, %c0_19] : memref<8x8x128xf32, #tpu.memory_space<vmem>>, vector<1x8x128xf32>
    %70 = vector.shape_cast %69 : vector<1x8x128xf32> to vector<8x128xf32>
    %71 = vector.shape_cast %67 : vector<8x128xf32> to vector<1x8x128xf32>
    tpu.vector_store %arg3[%68, %c0_18, %c0_19], %71 {strides = array<i32>} : memref<8x8x128xf32, #tpu.memory_space<vmem>>, vector<1x8x128xf32>,
    %c2_i32 = arith.constant 2 : i32
    %c0_20 = arith.constant 0 : index
    %c0_21 = arith.constant 0 : index
    %72 = vector.load %arg2[%c0_20, %c0_21] : memref<128x512xf32, #tpu.memory_space<vmem>>, vector<128x512xf32>
    %cst_22 = arith.constant dense<0.000000e+00> : vector<8x512xf32>
    %73 = tpu.matmul %67, %72, %cst_22 {dimension_numbers = #tpu.dot_dimension_numbers<[1], [0], [0], [1], [0, 0, 1, 1], [], []>} : vector<8x128xf32>, vector<128x512xf32>, vector<8x512xf32> -> vector<8x512xf32>
    %74 = arith.index_cast %c2_i32 : i32 to index
    %c0_23 = arith.constant 0 : index
    %c0_24 = arith.constant 0 : index
    %75 = vector.load %arg1[%74, %c0_23, %c0_24] : memref<8x8x512xf32, #tpu.memory_space<vmem>>, vector<1x8x512xf32>
    %76 = vector.shape_cast %75 : vector<1x8x512xf32> to vector<8x512xf32>
    %77 = arith.addf %73, %76 : vector<8x512xf32>
    %78 = vector.extract_strided_slice %77 {offsets = [0, 0], sizes = [8, 128], strides = [1, 1]} : vector<8x512xf32> to vector<8x128xf32>
    %79 = arith.negf %78 : vector<8x128xf32>
    %80 = math.exp %79 : vector<8x128xf32>
    %cst_25 = arith.constant 1.000000e+00 : f32
    %81 = vector.broadcast %cst_25 : f32 to vector<8x128xf32>
    %82 = arith.addf %81, %80 : vector<8x128xf32>
    %83 = arith.divf %81, %82 : vector<8x128xf32>
    %84 = vector.extract_strided_slice %77 {offsets = [0, 128], sizes = [8, 128], strides = [1, 1]} : vector<8x512xf32> to vector<8x128xf32>
    %85 = arith.negf %84 : vector<8x128xf32>
    %86 = math.exp %85 : vector<8x128xf32>
    %cst_26 = arith.constant 1.000000e+00 : f32
    %87 = vector.broadcast %cst_26 : f32 to vector<8x128xf32>
    %88 = arith.addf %87, %86 : vector<8x128xf32>
    %89 = arith.divf %87, %88 : vector<8x128xf32>
    %90 = vector.extract_strided_slice %77 {offsets = [0, 256], sizes = [8, 128], strides = [1, 1]} : vector<8x512xf32> to vector<8x128xf32>
    %91 = math.tanh %90 : vector<8x128xf32>
    %92 = vector.extract_strided_slice %77 {offsets = [0, 384], sizes = [8, 128], strides = [1, 1]} : vector<8x512xf32> to vector<8x128xf32>
    %93 = arith.negf %92 : vector<8x128xf32>
    %94 = math.exp %93 : vector<8x128xf32>
    %cst_27 = arith.constant 1.000000e+00 : f32
    %95 = vector.broadcast %cst_27 : f32 to vector<8x128xf32>
    %96 = arith.addf %95, %94 : vector<8x128xf32>
    %97 = arith.divf %95, %96 : vector<8x128xf32>
    %98 = arith.mulf %89, %65 : vector<8x128xf32>
    %99 = arith.mulf %83, %91 : vector<8x128xf32>
    %100 = arith.addf %98, %99 : vector<8x128xf32>
    %101 = math.tanh %100 : vector<8x128xf32>
    %102 = arith.mulf %97, %101 : vector<8x128xf32>
    %103 = arith.index_cast %c2_i32 : i32 to index
    %c0_28 = arith.constant 0 : index
    %c0_29 = arith.constant 0 : index
    %104 = vector.load %arg3[%103, %c0_28, %c0_29] : memref<8x8x128xf32, #tpu.memory_space<vmem>>, vector<1x8x128xf32>
    %105 = vector.shape_cast %104 : vector<1x8x128xf32> to vector<8x128xf32>
    %106 = vector.shape_cast %102 : vector<8x128xf32> to vector<1x8x128xf32>
    tpu.vector_store %arg3[%103, %c0_28, %c0_29], %106 {strides = array<i32>} : memref<8x8x128xf32, #tpu.memory_space<vmem>>, vector<1x8x128xf32>,
    %c3_i32 = arith.constant 3 : i32
    %c0_30 = arith.constant 0 : index
    %c0_31 = arith.constant 0 : index
    %107 = vector.load %arg2[%c0_30, %c0_31] : memref<128x512xf32, #tpu.memory_space<vmem>>, vector<128x512xf32>
    %cst_32 = arith.constant dense<0.000000e+00> : vector<8x512xf32>
    %108 = tpu.matmul %102, %107, %cst_32 {dimension_numbers = #tpu.dot_dimension_numbers<[1], [0], [0], [1], [0, 0, 1, 1], [], []>} : vector<8x128xf32>, vector<128x512xf32>, vector<8x512xf32> -> vector<8x512xf32>
    %109 = arith.index_cast %c3_i32 : i32 to index
    %c0_33 = arith.constant 0 : index
    %c0_34 = arith.constant 0 : index
    %110 = vector.load %arg1[%109, %c0_33, %c0_34] : memref<8x8x512xf32, #tpu.memory_space<vmem>>, vector<1x8x512xf32>
    %111 = vector.shape_cast %110 : vector<1x8x512xf32> to vector<8x512xf32>
    %112 = arith.addf %108, %111 : vector<8x512xf32>
    %113 = vector.extract_strided_slice %112 {offsets = [0, 0], sizes = [8, 128], strides = [1, 1]} : vector<8x512xf32> to vector<8x128xf32>
    %114 = arith.negf %113 : vector<8x128xf32>
    %115 = math.exp %114 : vector<8x128xf32>
    %cst_35 = arith.constant 1.000000e+00 : f32
    %116 = vector.broadcast %cst_35 : f32 to vector<8x128xf32>
    %117 = arith.addf %116, %115 : vector<8x128xf32>
    %118 = arith.divf %116, %117 : vector<8x128xf32>
    %119 = vector.extract_strided_slice %112 {offsets = [0, 128], sizes = [8, 128], strides = [1, 1]} : vector<8x512xf32> to vector<8x128xf32>
    %120 = arith.negf %119 : vector<8x128xf32>
    %121 = math.exp %120 : vector<8x128xf32>
    %cst_36 = arith.constant 1.000000e+00 : f32
    %122 = vector.broadcast %cst_36 : f32 to vector<8x128xf32>
    %123 = arith.addf %122, %121 : vector<8x128xf32>
    %124 = arith.divf %122, %123 : vector<8x128xf32>
    %125 = vector.extract_strided_slice %112 {offsets = [0, 256], sizes = [8, 128], strides = [1, 1]} : vector<8x512xf32> to vector<8x128xf32>
    %126 = math.tanh %125 : vector<8x128xf32>
    %127 = vector.extract_strided_slice %112 {offsets = [0, 384], sizes = [8, 128], strides = [1, 1]} : vector<8x512xf32> to vector<8x128xf32>
    %128 = arith.negf %127 : vector<8x128xf32>
    %129 = math.exp %128 : vector<8x128xf32>
    %cst_37 = arith.constant 1.000000e+00 : f32
    %130 = vector.broadcast %cst_37 : f32 to vector<8x128xf32>
    %131 = arith.addf %130, %129 : vector<8x128xf32>
    %132 = arith.divf %130, %131 : vector<8x128xf32>
    %133 = arith.mulf %124, %100 : vector<8x128xf32>
    %134 = arith.mulf %118, %126 : vector<8x128xf32>
    %135 = arith.addf %133, %134 : vector<8x128xf32>
    %136 = math.tanh %135 : vector<8x128xf32>
    %137 = arith.mulf %132, %136 : vector<8x128xf32>
    %138 = arith.index_cast %c3_i32 : i32 to index
    %c0_38 = arith.constant 0 : index
    %c0_39 = arith.constant 0 : index
    %139 = vector.load %arg3[%138, %c0_38, %c0_39] : memref<8x8x128xf32, #tpu.memory_space<vmem>>, vector<1x8x128xf32>
    %140 = vector.shape_cast %139 : vector<1x8x128xf32> to vector<8x128xf32>
    %141 = vector.shape_cast %137 : vector<8x128xf32> to vector<1x8x128xf32>
    tpu.vector_store %arg3[%138, %c0_38, %c0_39], %141 {strides = array<i32>} : memref<8x8x128xf32, #tpu.memory_space<vmem>>, vector<1x8x128xf32>,
    %c4_i32 = arith.constant 4 : i32
    %c0_40 = arith.constant 0 : index
    %c0_41 = arith.constant 0 : index
    %142 = vector.load %arg2[%c0_40, %c0_41] : memref<128x512xf32, #tpu.memory_space<vmem>>, vector<128x512xf32>
    %cst_42 = arith.constant dense<0.000000e+00> : vector<8x512xf32>
    %143 = tpu.matmul %137, %142, %cst_42 {dimension_numbers = #tpu.dot_dimension_numbers<[1], [0], [0], [1], [0, 0, 1, 1], [], []>} : vector<8x128xf32>, vector<128x512xf32>, vector<8x512xf32> -> vector<8x512xf32>
    %144 = arith.index_cast %c4_i32 : i32 to index
    %c0_43 = arith.constant 0 : index
    %c0_44 = arith.constant 0 : index
    %145 = vector.load %arg1[%144, %c0_43, %c0_44] : memref<8x8x512xf32, #tpu.memory_space<vmem>>, vector<1x8x512xf32>
    %146 = vector.shape_cast %145 : vector<1x8x512xf32> to vector<8x512xf32>
    %147 = arith.addf %143, %146 : vector<8x512xf32>
    %148 = vector.extract_strided_slice %147 {offsets = [0, 0], sizes = [8, 128], strides = [1, 1]} : vector<8x512xf32> to vector<8x128xf32>
    %149 = arith.negf %148 : vector<8x128xf32>
    %150 = math.exp %149 : vector<8x128xf32>
    %cst_45 = arith.constant 1.000000e+00 : f32
    %151 = vector.broadcast %cst_45 : f32 to vector<8x128xf32>
    %152 = arith.addf %151, %150 : vector<8x128xf32>
    %153 = arith.divf %151, %152 : vector<8x128xf32>
    %154 = vector.extract_strided_slice %147 {offsets = [0, 128], sizes = [8, 128], strides = [1, 1]} : vector<8x512xf32> to vector<8x128xf32>
    %155 = arith.negf %154 : vector<8x128xf32>
    %156 = math.exp %155 : vector<8x128xf32>
    %cst_46 = arith.constant 1.000000e+00 : f32
    %157 = vector.broadcast %cst_46 : f32 to vector<8x128xf32>
    %158 = arith.addf %157, %156 : vector<8x128xf32>
    %159 = arith.divf %157, %158 : vector<8x128xf32>
    %160 = vector.extract_strided_slice %147 {offsets = [0, 256], sizes = [8, 128], strides = [1, 1]} : vector<8x512xf32> to vector<8x128xf32>
    %161 = math.tanh %160 : vector<8x128xf32>
    %162 = vector.extract_strided_slice %147 {offsets = [0, 384], sizes = [8, 128], strides = [1, 1]} : vector<8x512xf32> to vector<8x128xf32>
    %163 = arith.negf %162 : vector<8x128xf32>
    %164 = math.exp %163 : vector<8x128xf32>
    %cst_47 = arith.constant 1.000000e+00 : f32
    %165 = vector.broadcast %cst_47 : f32 to vector<8x128xf32>
    %166 = arith.addf %165, %164 : vector<8x128xf32>
    %167 = arith.divf %165, %166 : vector<8x128xf32>
    %168 = arith.mulf %159, %135 : vector<8x128xf32>
    %169 = arith.mulf %153, %161 : vector<8x128xf32>
    %170 = arith.addf %168, %169 : vector<8x128xf32>
    %171 = math.tanh %170 : vector<8x128xf32>
    %172 = arith.mulf %167, %171 : vector<8x128xf32>
    %173 = arith.index_cast %c4_i32 : i32 to index
    %c0_48 = arith.constant 0 : index
    %c0_49 = arith.constant 0 : index
    %174 = vector.load %arg3[%173, %c0_48, %c0_49] : memref<8x8x128xf32, #tpu.memory_space<vmem>>, vector<1x8x128xf32>
    %175 = vector.shape_cast %174 : vector<1x8x128xf32> to vector<8x128xf32>
    %176 = vector.shape_cast %172 : vector<8x128xf32> to vector<1x8x128xf32>
    tpu.vector_store %arg3[%173, %c0_48, %c0_49], %176 {strides = array<i32>} : memref<8x8x128xf32, #tpu.memory_space<vmem>>, vector<1x8x128xf32>,
    %c5_i32 = arith.constant 5 : i32
    %c0_50 = arith.constant 0 : index
    %c0_51 = arith.constant 0 : index
    %177 = vector.load %arg2[%c0_50, %c0_51] : memref<128x512xf32, #tpu.memory_space<vmem>>, vector<128x512xf32>
    %cst_52 = arith.constant dense<0.000000e+00> : vector<8x512xf32>
    %178 = tpu.matmul %172, %177, %cst_52 {dimension_numbers = #tpu.dot_dimension_numbers<[1], [0], [0], [1], [0, 0, 1, 1], [], []>} : vector<8x128xf32>, vector<128x512xf32>, vector<8x512xf32> -> vector<8x512xf32>
    %179 = arith.index_cast %c5_i32 : i32 to index
    %c0_53 = arith.constant 0 : index
    %c0_54 = arith.constant 0 : index
    %180 = vector.load %arg1[%179, %c0_53, %c0_54] : memref<8x8x512xf32, #tpu.memory_space<vmem>>, vector<1x8x512xf32>
    %181 = vector.shape_cast %180 : vector<1x8x512xf32> to vector<8x512xf32>
    %182 = arith.addf %178, %181 : vector<8x512xf32>
    %183 = vector.extract_strided_slice %182 {offsets = [0, 0], sizes = [8, 128], strides = [1, 1]} : vector<8x512xf32> to vector<8x128xf32>
    %184 = arith.negf %183 : vector<8x128xf32>
    %185 = math.exp %184 : vector<8x128xf32>
    %cst_55 = arith.constant 1.000000e+00 : f32
    %186 = vector.broadcast %cst_55 : f32 to vector<8x128xf32>
    %187 = arith.addf %186, %185 : vector<8x128xf32>
    %188 = arith.divf %186, %187 : vector<8x128xf32>
    %189 = vector.extract_strided_slice %182 {offsets = [0, 128], sizes = [8, 128], strides = [1, 1]} : vector<8x512xf32> to vector<8x128xf32>
    %190 = arith.negf %189 : vector<8x128xf32>
    %191 = math.exp %190 : vector<8x128xf32>
    %cst_56 = arith.constant 1.000000e+00 : f32
    %192 = vector.broadcast %cst_56 : f32 to vector<8x128xf32>
    %193 = arith.addf %192, %191 : vector<8x128xf32>
    %194 = arith.divf %192, %193 : vector<8x128xf32>
    %195 = vector.extract_strided_slice %182 {offsets = [0, 256], sizes = [8, 128], strides = [1, 1]} : vector<8x512xf32> to vector<8x128xf32>
    %196 = math.tanh %195 : vector<8x128xf32>
    %197 = vector.extract_strided_slice %182 {offsets = [0, 384], sizes = [8, 128], strides = [1, 1]} : vector<8x512xf32> to vector<8x128xf32>
    %198 = arith.negf %197 : vector<8x128xf32>
    %199 = math.exp %198 : vector<8x128xf32>
    %cst_57 = arith.constant 1.000000e+00 : f32
    %200 = vector.broadcast %cst_57 : f32 to vector<8x128xf32>
    %201 = arith.addf %200, %199 : vector<8x128xf32>
    %202 = arith.divf %200, %201 : vector<8x128xf32>
    %203 = arith.mulf %194, %170 : vector<8x128xf32>
    %204 = arith.mulf %188, %196 : vector<8x128xf32>
    %205 = arith.addf %203, %204 : vector<8x128xf32>
    %206 = math.tanh %205 : vector<8x128xf32>
    %207 = arith.mulf %202, %206 : vector<8x128xf32>
    %208 = arith.index_cast %c5_i32 : i32 to index
    %c0_58 = arith.constant 0 : index
    %c0_59 = arith.constant 0 : index
    %209 = vector.load %arg3[%208, %c0_58, %c0_59] : memref<8x8x128xf32, #tpu.memory_space<vmem>>, vector<1x8x128xf32>
    %210 = vector.shape_cast %209 : vector<1x8x128xf32> to vector<8x128xf32>
    %211 = vector.shape_cast %207 : vector<8x128xf32> to vector<1x8x128xf32>
    tpu.vector_store %arg3[%208, %c0_58, %c0_59], %211 {strides = array<i32>} : memref<8x8x128xf32, #tpu.memory_space<vmem>>, vector<1x8x128xf32>,
    %c6_i32 = arith.constant 6 : i32
    %c0_60 = arith.constant 0 : index
    %c0_61 = arith.constant 0 : index
    %212 = vector.load %arg2[%c0_60, %c0_61] : memref<128x512xf32, #tpu.memory_space<vmem>>, vector<128x512xf32>
    %cst_62 = arith.constant dense<0.000000e+00> : vector<8x512xf32>
    %213 = tpu.matmul %207, %212, %cst_62 {dimension_numbers = #tpu.dot_dimension_numbers<[1], [0], [0], [1], [0, 0, 1, 1], [], []>} : vector<8x128xf32>, vector<128x512xf32>, vector<8x512xf32> -> vector<8x512xf32>
    %214 = arith.index_cast %c6_i32 : i32 to index
    %c0_63 = arith.constant 0 : index
    %c0_64 = arith.constant 0 : index
    %215 = vector.load %arg1[%214, %c0_63, %c0_64] : memref<8x8x512xf32, #tpu.memory_space<vmem>>, vector<1x8x512xf32>
    %216 = vector.shape_cast %215 : vector<1x8x512xf32> to vector<8x512xf32>
    %217 = arith.addf %213, %216 : vector<8x512xf32>
    %218 = vector.extract_strided_slice %217 {offsets = [0, 0], sizes = [8, 128], strides = [1, 1]} : vector<8x512xf32> to vector<8x128xf32>
    %219 = arith.negf %218 : vector<8x128xf32>
    %220 = math.exp %219 : vector<8x128xf32>
    %cst_65 = arith.constant 1.000000e+00 : f32
    %221 = vector.broadcast %cst_65 : f32 to vector<8x128xf32>
    %222 = arith.addf %221, %220 : vector<8x128xf32>
    %223 = arith.divf %221, %222 : vector<8x128xf32>
    %224 = vector.extract_strided_slice %217 {offsets = [0, 128], sizes = [8, 128], strides = [1, 1]} : vector<8x512xf32> to vector<8x128xf32>
    %225 = arith.negf %224 : vector<8x128xf32>
    %226 = math.exp %225 : vector<8x128xf32>
    %cst_66 = arith.constant 1.000000e+00 : f32
    %227 = vector.broadcast %cst_66 : f32 to vector<8x128xf32>
    %228 = arith.addf %227, %226 : vector<8x128xf32>
    %229 = arith.divf %227, %228 : vector<8x128xf32>
    %230 = vector.extract_strided_slice %217 {offsets = [0, 256], sizes = [8, 128], strides = [1, 1]} : vector<8x512xf32> to vector<8x128xf32>
    %231 = math.tanh %230 : vector<8x128xf32>
    %232 = vector.extract_strided_slice %217 {offsets = [0, 384], sizes = [8, 128], strides = [1, 1]} : vector<8x512xf32> to vector<8x128xf32>
    %233 = arith.negf %232 : vector<8x128xf32>
    %234 = math.exp %233 : vector<8x128xf32>
    %cst_67 = arith.constant 1.000000e+00 : f32
    %235 = vector.broadcast %cst_67 : f32 to vector<8x128xf32>
    %236 = arith.addf %235, %234 : vector<8x128xf32>
    %237 = arith.divf %235, %236 : vector<8x128xf32>
    %238 = arith.mulf %229, %205 : vector<8x128xf32>
    %239 = arith.mulf %223, %231 : vector<8x128xf32>
    %240 = arith.addf %238, %239 : vector<8x128xf32>
    %241 = math.tanh %240 : vector<8x128xf32>
    %242 = arith.mulf %237, %241 : vector<8x128xf32>
    %243 = arith.index_cast %c6_i32 : i32 to index
    %c0_68 = arith.constant 0 : index
    %c0_69 = arith.constant 0 : index
    %244 = vector.load %arg3[%243, %c0_68, %c0_69] : memref<8x8x128xf32, #tpu.memory_space<vmem>>, vector<1x8x128xf32>
    %245 = vector.shape_cast %244 : vector<1x8x128xf32> to vector<8x128xf32>
    %246 = vector.shape_cast %242 : vector<8x128xf32> to vector<1x8x128xf32>
    tpu.vector_store %arg3[%243, %c0_68, %c0_69], %246 {strides = array<i32>} : memref<8x8x128xf32, #tpu.memory_space<vmem>>, vector<1x8x128xf32>,
    %c7_i32 = arith.constant 7 : i32
    %c0_70 = arith.constant 0 : index
    %c0_71 = arith.constant 0 : index
    %247 = vector.load %arg2[%c0_70, %c0_71] : memref<128x512xf32, #tpu.memory_space<vmem>>, vector<128x512xf32>
    %cst_72 = arith.constant dense<0.000000e+00> : vector<8x512xf32>
    %248 = tpu.matmul %242, %247, %cst_72 {dimension_numbers = #tpu.dot_dimension_numbers<[1], [0], [0], [1], [0, 0, 1, 1], [], []>} : vector<8x128xf32>, vector<128x512xf32>, vector<8x512xf32> -> vector<8x512xf32>
    %249 = arith.index_cast %c7_i32 : i32 to index
    %c0_73 = arith.constant 0 : index
    %c0_74 = arith.constant 0 : index
    %250 = vector.load %arg1[%249, %c0_73, %c0_74] : memref<8x8x512xf32, #tpu.memory_space<vmem>>, vector<1x8x512xf32>
    %251 = vector.shape_cast %250 : vector<1x8x512xf32> to vector<8x512xf32>
    %252 = arith.addf %248, %251 : vector<8x512xf32>
    %253 = vector.extract_strided_slice %252 {offsets = [0, 0], sizes = [8, 128], strides = [1, 1]} : vector<8x512xf32> to vector<8x128xf32>
    %254 = arith.negf %253 : vector<8x128xf32>
    %255 = math.exp %254 : vector<8x128xf32>
    %cst_75 = arith.constant 1.000000e+00 : f32
    %256 = vector.broadcast %cst_75 : f32 to vector<8x128xf32>
    %257 = arith.addf %256, %255 : vector<8x128xf32>
    %258 = arith.divf %256, %257 : vector<8x128xf32>
    %259 = vector.extract_strided_slice %252 {offsets = [0, 128], sizes = [8, 128], strides = [1, 1]} : vector<8x512xf32> to vector<8x128xf32>
    %260 = arith.negf %259 : vector<8x128xf32>
    %261 = math.exp %260 : vector<8x128xf32>
    %cst_76 = arith.constant 1.000000e+00 : f32
    %262 = vector.broadcast %cst_76 : f32 to vector<8x128xf32>
    %263 = arith.addf %262, %261 : vector<8x128xf32>
    %264 = arith.divf %262, %263 : vector<8x128xf32>
    %265 = vector.extract_strided_slice %252 {offsets = [0, 256], sizes = [8, 128], strides = [1, 1]} : vector<8x512xf32> to vector<8x128xf32>
    %266 = math.tanh %265 : vector<8x128xf32>
    %267 = vector.extract_strided_slice %252 {offsets = [0, 384], sizes = [8, 128], strides = [1, 1]} : vector<8x512xf32> to vector<8x128xf32>
    %268 = arith.negf %267 : vector<8x128xf32>
    %269 = math.exp %268 : vector<8x128xf32>
    %cst_77 = arith.constant 1.000000e+00 : f32
    %270 = vector.broadcast %cst_77 : f32 to vector<8x128xf32>
    %271 = arith.addf %270, %269 : vector<8x128xf32>
    %272 = arith.divf %270, %271 : vector<8x128xf32>
    %273 = arith.mulf %264, %240 : vector<8x128xf32>
    %274 = arith.mulf %258, %266 : vector<8x128xf32>
    %275 = arith.addf %273, %274 : vector<8x128xf32>
    %276 = math.tanh %275 : vector<8x128xf32>
    %277 = arith.mulf %272, %276 : vector<8x128xf32>
    %278 = arith.index_cast %c7_i32 : i32 to index
    %c0_78 = arith.constant 0 : index
    %c0_79 = arith.constant 0 : index
    %279 = vector.load %arg3[%278, %c0_78, %c0_79] : memref<8x8x128xf32, #tpu.memory_space<vmem>>, vector<1x8x128xf32>
    %280 = vector.shape_cast %279 : vector<1x8x128xf32> to vector<8x128xf32>
    %281 = vector.shape_cast %277 : vector<8x128xf32> to vector<1x8x128xf32>
    tpu.vector_store %arg3[%278, %c0_78, %c0_79], %281 {strides = array<i32>} : memref<8x8x128xf32, #tpu.memory_space<vmem>>, vector<1x8x128xf32>,
    %c8_i32 = arith.constant 8 : i32
    %c0_80 = arith.constant 0 : index
    %c0_81 = arith.constant 0 : index
    %282 = vector.load %arg4[%c0_80, %c0_81] : memref<8x128xf32, #tpu.memory_space<vmem>>, vector<8x128xf32>
    tpu.vector_store %arg4[%c0_80, %c0_81], %275 {strides = array<i32>} : memref<8x128xf32, #tpu.memory_space<vmem>>, vector<8x128xf32>,
    return
  }
  func.func @transform_0(%arg0: i32) -> (i32, i32, i32) {
    %c0_i32 = arith.constant 0 : i32
    %c0_i32_0 = arith.constant 0 : i32
    %c0_i32_1 = arith.constant 0 : i32
    %c0_i32_2 = arith.constant 0 : i32
    return %c0_i32, %c0_i32_0, %c0_i32_1 : i32, i32, i32
  }
  func.func @transform_1(%arg0: i32) -> (i32, i32) {
    %c0_i32 = arith.constant 0 : i32
    %c0_i32_0 = arith.constant 0 : i32
    %c0_i32_1 = arith.constant 0 : i32
    return %c0_i32, %c0_i32_0 : i32, i32
  }
  func.func @transform_2(%arg0: i32) -> (i32, i32, i32) {
    %c0_i32 = arith.constant 0 : i32
    %c0_i32_0 = arith.constant 0 : i32
    %c0_i32_1 = arith.constant 0 : i32
    %c0_i32_2 = arith.constant 0 : i32
    return %c0_i32, %c0_i32_0, %c0_i32_1 : i32, i32, i32
  }
  func.func @transform_3(%arg0: i32) -> (i32, i32) {
    %c0_i32 = arith.constant 0 : i32
    %c0_i32_0 = arith.constant 0 : i32
    %c0_i32_1 = arith.constant 0 : i32
    return %c0_i32, %c0_i32_0 : i32, i32
  }
}

</mosaic_0001>

<bundles_post_ra>
// kernel: tpu_custom_call.1
= control target key start
LH: loop header
LB: loop body
LE: loop exit
PB: predicated region body
PF: predicated region fallthrough
CT: control target
= control target key end

     0   :  { %9 = vsyncpa [#allocation3], 0  ;;  %s3237_s0 = inlined_call_operand.hbm [shape: f32[8,8,512], index: 0, kind: input, shape index: {}]   ;;  %s3238_s1 = inlined_call_operand.hbm [shape: f32[128,512], index: 1, kind: input, shape index: {}]   ;;  %s3239_s2 = inlined_call_operand.hbm [shape: f32[8,8,128], index: 2, kind: output, shape index: {0}]   ;;  %s3240_s3 = inlined_call_operand.hbm [shape: f32[8,128], index: 3, kind: output, shape index: {1}]  }
   0x1   :  { %10 = vsyncpa [#allocation6], 0 }
   0x2   :  { %11 = vsyncpa [#allocation4], 0 }
   0x3   :  { %12 = vsyncpa [#allocation9], 0  ;;  %s2739_s12 = smov [#allocation2]   ;;  %s2643_s16 = scalar_lea.hbm %s3237_s0, 4096 }
   0x4   :  { %s18_s13 = sshll.u32 %s2739_s12, 4  ;;  %p2644_p0 = scmp.ne.s32.totalorder %s3237_s0, %s2643_s16  ;;  %s19_s13 = int_to_ptr.vmem [resolvable:$true] %s18_s13 }
   0x5   :  { %p2647_p1 = scmp.lt.u32.totalorder %s2643_s16, %s3237_s0 }
   0x7   :  { %p2649_p2 = pnand %p2647_p1, %p2644_p0 }
   0x9   :  { %2652 = shalt.err (!%p2649_p2)
}
   0xa   :  { %s2653_s21 = scalar_lea.vmem %s19_s13, 4096  ;;  %p2658_p4 = scmp.lt.s32.totalorder %s19_s13, %s19_s13 }
   0xb   :  { %p2654_p3 = scmp.ne.s32.totalorder %s19_s13, %s2653_s21  ;;  %p2659_p5 = scmp.lt.s32.totalorder %s2653_s21, %s2653_s21 }
   0xd   :  { %p2660_p6 = por %p2659_p5, %p2658_p4 }
   0xf   :  { %p2661_p7 = pnand %p2660_p6, %p2654_p3 }
  0x11   :  { %2664 = shalt.err (!%p2661_p7)
}
  0x12   :  { %s2740_s22 = smov 512   ;;  %s2741_s23 = smov 32  }
  0x13   :  { %24 = dma.hbm_to_vmem [thread:$0]  %s3237_s0, 4096, %s19_s13, [#allocation3], %s2740_s22, %s2740_s22, %s2741_s23  }
  0x14   :  { %s2742_s26 = smov [#allocation5]   ;;  %s2665_s30 = scalar_lea.hbm %s3238_s1, 8192 }
  0x15   :  { %s30_s27 = sshll.u32 %s2742_s26, 4  ;;  %p2666_p8 = scmp.ne.s32.totalorder %s3238_s1, %s2665_s30  ;;  %s31_s27 = int_to_ptr.vmem [resolvable:$true] %s30_s27 }
  0x16   :  { %p2669_p9 = scmp.lt.u32.totalorder %s2665_s30, %s3238_s1 }
  0x18   :  { %p2671_p10 = pnand %p2669_p9, %p2666_p8 }
  0x1a   :  { %2674 = shalt.err (!%p2671_p10)
}
  0x1b   :  { %s2675_s8 = scalar_lea.vmem %s31_s27, 8192  ;;  %p2680_p12 = scmp.lt.s32.totalorder %s31_s27, %s31_s27 }
  0x1c   :  { %p2676_p11 = scmp.ne.s32.totalorder %s31_s27, %s2675_s8  ;;  %p2681_p13 = scmp.lt.s32.totalorder %s2675_s8, %s2675_s8 }
  0x1e   :  { %p2682_p0 = por %p2681_p13, %p2680_p12 }
  0x20   :  { %p2683_p1 = pnand %p2682_p0, %p2676_p11 }
  0x22   :  { %2686 = shalt.err (!%p2683_p1)
}
  0x23   :  { %36 = dma.hbm_to_vmem [thread:$0]  %s3238_s1, 8192, %s31_s27, [#allocation6], %s2740_s22, %s2740_s22, %s2741_s23  }
  0x24   :  { %2731 = dma.done.wait [#allocation3], 4096  }
  0x25   :  { %2732 = vsyncadd [#allocation3], 4294963200 }
  0x26   :  { %2733 = dma.done.wait [#allocation6], 8192  }
  0x27   :  { %2734 = vsyncadd [#allocation6], 4294959104  ;;  %v2743_v0 = vmov 0.0   ;;  %v44_v1 = vld [vmem:[#allocation5 + $0x8] sm:$0xff]  ;;  %v43_v3 = vld [vmem:[#allocation5] sm:$0xff]  ;;  %s2744_s1 = smov [#allocation8]  }
  0x28   :  { %175 = vmatprep.mubr.f32.mxu0 %v2743_v0  ;;  %246 = vmatprep.mubr.f32.mxu1 %v2743_v0  ;;  %v48_v2 = vld [vmem:[#allocation5 + $0x28] sm:$0xff]  ;;  %v47_v5 = vld [vmem:[#allocation5 + $0x20] sm:$0xff]  ;;  %v46_v19 = vld [vmem:[#allocation5 + $0x18] sm:$0xff]  ;;  %s1956_s10 = sshll.u32 %s2744_s1, 4  ;;  %s1957_s10 = int_to_ptr.vmem [resolvable:$true] %s1956_s10 }
  0x29   :  { %v2794_v4 = vpack.c.bf16 %v48_v2, %v44_v1  ;;  %v52_v6 = vld [vmem:[#allocation5 + $0x48] sm:$0xff]  ;;  %v2796_v8 = vpack.c.bf16 %v47_v5, %v43_v3  ;;  %v51_v10 = vld [vmem:[#allocation5 + $0x40] sm:$0xff]  ;;  %v50_v20 = vld [vmem:[#allocation5 + $0x38] sm:$0xff]  ;;  %s2687_s11 = scalar_lea.vmem %s1957_s10, 128  ;;  %p2692_p3 = scmp.lt.s32.totalorder %s1957_s10, %s1957_s10 }
  0x2a   :  { %v56_v7 = vld [vmem:[#allocation5 + $0x68] sm:$0xff]  ;;  %v55_v11 = vld [vmem:[#allocation5 + $0x60] sm:$0xff]  ;;  %v2807_v22 = vpack.c.bf16 %v50_v20, %v46_v19  ;;  %v45_v23 = vld [vmem:[#allocation5 + $0x10] sm:$0xff]  ;;  %p2688_p2 = scmp.ne.s32.totalorder %s1957_s10, %s2687_s11  ;;  %p2693_p4 = scmp.lt.s32.totalorder %s2687_s11, %s2687_s11 }
  0x2b   :  { %v2798_v9 = vpack.c.bf16 %v56_v7, %v52_v6  ;;  %v60_v12 = vld [vmem:[#allocation5 + $0x88] sm:$0xff]  ;;  %1995 = vmatprep.subr.bf16.mxu0 %v2794_v4  ;;  %v2802_v14 = vpack.c.bf16 %v55_v11, %v51_v10  ;;  %v59_v15 = vld [vmem:[#allocation5 + $0x80] sm:$0xff]  ;;  %v49_v24 = vld [vmem:[#allocation5 + $0x30] sm:$0xff] }
  0x2c   :  { %v64_v13 = vld [vmem:[#allocation5 + $0xa8] sm:$0xff]  ;;  %1997 = vmatpush1.bf16.msra.mxu0 %v2796_v8  ;;  %v63_v16 = vld [vmem:[#allocation5 + $0xa0] sm:$0xff]  ;;  %v2809_v25 = vpack.c.bf16 %v49_v24, %v45_v23  ;;  %2027 = vmatprep.subr.bf16.mxu1 %v2807_v22  ;;  %v54_v27 = vld [vmem:[#allocation5 + $0x58] sm:$0xff]  ;;  %p2694_p5 = por %p2693_p4, %p2692_p3 }
  0x2d   :  { %1999 = vmatprep.subr.bf16.mxu0 %v2798_v9  ;;  %v2805_v17 = vpack.c.bf16 %v64_v13, %v60_v12  ;;  %v68_v18 = vld [vmem:[#allocation5 + $0xc8] sm:$0xff]  ;;  %v2812_v26 = vpack.c.bf16 %v63_v16, %v59_v15  ;;  %v58_v28 = vld [vmem:[#allocation5 + $0x78] sm:$0xff]  ;;  %v53_v29 = vld [vmem:[#allocation5 + $0x50] sm:$0xff] }
  0x2e   :  { %v72_v21 = vld [vmem:[#allocation5 + $0xe8] sm:$0xff]  ;;  %v67_v31 = vld [vmem:[#allocation5 + $0xc0] sm:$0xff]  ;;  %2029 = vmatpush1.bf16.msra.mxu1 %v2809_v25  ;;  %v2819_v33 = vpack.c.bf16 %v58_v28, %v54_v27  ;;  %v57_v34 = vld [vmem:[#allocation5 + $0x70] sm:$0xff]  ;;  %p2695_p6 = pnand %p2694_p5, %p2688_p2 }
  0x2f   :  { %v2816_v30 = vpack.c.bf16 %v72_v21, %v68_v18  ;;  %v71_v32 = vld [vmem:[#allocation5 + $0xe0] sm:$0xff]  ;;  %v76_v35 = vld [vmem:[#allocation5 + $0x108] sm:$0xff]  ;;  %v2821_v37 = vpack.c.bf16 %v57_v34, %v53_v29  ;;  %v62_v38 = vld [vmem:[#allocation5 + $0x98] sm:$0xff] }
  0x30   :  { %2001 = vmatpush1.bf16.msra.mxu0 %v2802_v14  ;;  %v80_v36 = vld [vmem:[#allocation5 + $0x128] sm:$0xff]  ;;  %2031 = vmatprep.subr.bf16.mxu1 %v2819_v33  ;;  %v66_v39 = vld [vmem:[#allocation5 + $0xb8] sm:$0xff]  ;;  %v61_v40 = vld [vmem:[#allocation5 + $0x90] sm:$0xff]  ;;  %v2825_v42 = vpack.c.bf16 %v71_v32, %v67_v31 }
  0x31   :  { %2003 = vmatprep.subr.bf16.mxu0 %v2805_v17  ;;  %v65_v41 = vld [vmem:[#allocation5 + $0xb0] sm:$0xff]  ;;  %v75_v43 = vld [vmem:[#allocation5 + $0x100] sm:$0xff]  ;;  %v2827_v45 = vpack.c.bf16 %v66_v39, %v62_v38  ;;  %v2830_v46 = vpack.c.bf16 %v80_v36, %v76_v35  ;;  %v84_v47 = vld [vmem:[#allocation5 + $0x148] sm:$0xff] }
  0x32   :  { %v79_v44 = vld [vmem:[#allocation5 + $0x120] sm:$0xff]  ;;  %2033 = vmatpush1.bf16.msra.mxu1 %v2821_v37  ;;  %v2833_v48 = vpack.c.bf16 %v65_v41, %v61_v40  ;;  %v70_v49 = vld [vmem:[#allocation5 + $0xd8] sm:$0xff]  ;;  %v88_v51 = vld [vmem:[#allocation5 + $0x168] sm:$0xff] }
  0x33   :  { %v74_v50 = vld [vmem:[#allocation5 + $0xf8] sm:$0xff]  ;;  %2035 = vmatprep.subr.bf16.mxu1 %v2827_v45  ;;  %v69_v53 = vld [vmem:[#allocation5 + $0xd0] sm:$0xff]  ;;  %v2839_v55 = vpack.c.bf16 %v79_v44, %v75_v43  ;;  %v2842_v58 = vpack.c.bf16 %v88_v51, %v84_v47  ;;  %v83_v59 = vld [vmem:[#allocation5 + $0x140] sm:$0xff] }
  0x34   :  { %2005 = vmatpush1.bf16.msra.mxu0 %v2812_v26  ;;  %v2836_v52 = vpack.c.bf16 %v74_v50, %v70_v49  ;;  %v73_v54 = vld [vmem:[#allocation5 + $0xf0] sm:$0xff]  ;;  %v78_v56 = vld [vmem:[#allocation5 + $0x118] sm:$0xff]  ;;  %v87_v60 = vld [vmem:[#allocation5 + $0x160] sm:$0xff] }
  0x35   :  { %2007 = vmatprep.subr.bf16.mxu0 %v2816_v30  ;;  %v82_v57 = vld [vmem:[#allocation5 + $0x138] sm:$0xff]  ;;  %v92_v61 = vld [vmem:[#allocation5 + $0x188] sm:$0xff]  ;;  %v2845_v62 = vpack.c.bf16 %v73_v54, %v69_v53  ;;  %v77_v2 = vld [vmem:[#allocation5 + $0x110] sm:$0xff]  ;;  %v2851_v7 = vpack.c.bf16 %v87_v60, %v83_v59 }
  0x36   :  { %2037 = vmatpush1.bf16.msra.mxu1 %v2833_v48  ;;  %v96_v63 = vld [vmem:[#allocation5 + $0x1a8] sm:$0xff]  ;;  %v2848_v1 = vpack.c.bf16 %v82_v57, %v78_v56  ;;  %v81_v3 = vld [vmem:[#allocation5 + $0x130] sm:$0xff]  ;;  %v86_v5 = vld [vmem:[#allocation5 + $0x158] sm:$0xff] }
  0x37   :  { %2039 = vmatprep.subr.bf16.mxu1 %v2836_v52  ;;  %v90_v6 = vld [vmem:[#allocation5 + $0x178] sm:$0xff]  ;;  %v2854_v10 = vpack.c.bf16 %v96_v63, %v92_v61  ;;  %v91_v11 = vld [vmem:[#allocation5 + $0x180] sm:$0xff]  ;;  %v100_v13 = vld [vmem:[#allocation5 + $0x1c8] sm:$0xff]  ;;  %v2857_v15 = vpack.c.bf16 %v81_v3, %v77_v2 }
  0x38   :  { %2009 = vmatpush1.bf16.msra.mxu0 %v2825_v42  ;;  %v95_v12 = vld [vmem:[#allocation5 + $0x1a0] sm:$0xff]  ;;  %v104_v16 = vld [vmem:[#allocation5 + $0x1e8] sm:$0xff]  ;;  %v2860_v18 = vpack.c.bf16 %v90_v6, %v86_v5  ;;  %v85_v19 = vld [vmem:[#allocation5 + $0x150] sm:$0xff] }
  0x39   :  { %2011 = vmatprep.subr.bf16.mxu0 %v2830_v46  ;;  %v89_v20 = vld [vmem:[#allocation5 + $0x170] sm:$0xff]  ;;  %v94_v21 = vld [vmem:[#allocation5 + $0x198] sm:$0xff]  ;;  %v2863_v24 = vpack.c.bf16 %v95_v12, %v91_v11  ;;  %v2866_v27 = vpack.c.bf16 %v104_v16, %v100_v13  ;;  %v99_v28 = vld [vmem:[#allocation5 + $0x1c0] sm:$0xff] }
  0x3a   :  { %2041 = vmatpush1.bf16.msra.mxu1 %v2845_v62  ;;  %v98_v23 = vld [vmem:[#allocation5 + $0x1b8] sm:$0xff]  ;;  %v103_v29 = vld [vmem:[#allocation5 + $0x1e0] sm:$0xff]  ;;  %v2869_v31 = vpack.c.bf16 %v89_v20, %v85_v19  ;;  %v93_v34 = vld [vmem:[#allocation5 + $0x190] sm:$0xff] }
  0x3b   :  { %2043 = vmatprep.subr.bf16.mxu1 %v2848_v1  ;;  %v2872_v32 = vpack.c.bf16 %v98_v23, %v94_v21  ;;  %v97_v35 = vld [vmem:[#allocation5 + $0x1b0] sm:$0xff]  ;;  %v102_v36 = vld [vmem:[#allocation5 + $0x1d8] sm:$0xff]  ;;  %v2875_v39 = vpack.c.bf16 %v103_v29, %v99_v28  ;;  %v107_v49 = vld [vmem:[#allocation2] sm:$0xff] }
  0x3c   :  { %2013 = vmatpush1.bf16.msra.mxu0 %v2839_v55  ;;  %v106_v38 = vld [vmem:[#allocation5 + $0x1f8] sm:$0xff]  ;;  %v2879_v40 = vpack.c.bf16 %v97_v35, %v93_v34  ;;  %v101_v43 = vld [vmem:[#allocation5 + $0x1d0] sm:$0xff]  ;;  %v108_v50 = vld [vmem:[#allocation2 + $0x8] sm:$0xff] }
  0x3d   :  { %2015 = vmatprep.subr.bf16.mxu0 %v2842_v58  ;;  %v2882_v41 = vpack.c.bf16 %v106_v38, %v102_v36  ;;  %v105_v44 = vld [vmem:[#allocation5 + $0x1f0] sm:$0xff]  ;;  %v110_v60 = vld [vmem:[#allocation2 + $0x18] sm:$0xff] }
  0x3e   :  { %2045 = vmatpush1.bf16.msra.mxu1 %v2857_v15  ;;  %v2886_v47 = vpack.c.bf16 %v105_v44, %v101_v43  ;;  %v109_v3 = vld [vmem:[#allocation2 + $0x10] sm:$0xff] }
  0x3f   :  { %2047 = vmatprep.subr.bf16.mxu1 %v2860_v18 }
  0x40   :  { %2017 = vmatpush1.bf16.msra.mxu0 %v2851_v7 }
  0x41   :  { %2019 = vmatprep.subr.bf16.mxu0 %v2854_v10 }
  0x42   :  { %2049 = vmatpush1.bf16.msra.mxu1 %v2869_v31 }
  0x43   :  { %2051 = vmatprep.subr.bf16.mxu1 %v2872_v32 }
  0x44   :  { %2021 = vmatpush1.bf16.msra.mxu0 %v2863_v24 }
  0x45   :  { %2023 = vmatprep.subr.bf16.mxu0 %v2866_v27 }
  0x46   :  { %2053 = vmatpush1.bf16.msra.mxu1 %v2879_v40 }
  0x47   :  { %2055 = vmatprep.subr.bf16.mxu1 %v2882_v41 }
  0x48   :  { %2025 = vmatpush1.bf16.msra.mxu0 %v2875_v39 }
  0x49   :  { %2059 = vmatprep.subr.bf16.mxu0 %v2794_v4 }
  0x4a   :  { %2057 = vmatpush1.bf16.msra.mxu1 %v2886_v47 }
  0x4b   :  { %176 = vmatmul.mubr.f32.vlgmr.msra.gmra.mrb[0].mxu0 %v2743_v0  ;;  %2091 = vmatprep.subr.bf16.mxu1 %v2807_v22 }
  0x4c   :  { %2061 = vmatpush1.bf16.msra.mxu0 %v2796_v8  ;;  %411 = vmatprep.mubr.f32.mxu0 %v2743_v0 }
  0x4d   :  { %2063 = vmatprep.subr.bf16.mxu0 %v2798_v9  ;;  %247 = vmatmul.mubr.f32.vlgmr.msra.gmra.mrb[0].mxu1 %v2743_v0 }
  0x4e   :  { %2093 = vmatpush1.bf16.msra.mxu1 %v2809_v25  ;;  %482 = vmatprep.mubr.f32.mxu1 %v2743_v0 }
  0x4f   :  { %2095 = vmatprep.subr.bf16.mxu1 %v2819_v33 }
  0x50   :  { %2065 = vmatpush1.bf16.msra.mxu0 %v2802_v14 }
  0x51   :  { %2067 = vmatprep.subr.bf16.mxu0 %v2805_v17 }
  0x52   :  { %2097 = vmatpush1.bf16.msra.mxu1 %v2821_v37 }
  0x53   :  { %2099 = vmatprep.subr.bf16.mxu1 %v2827_v45 }
  0x54   :  { %2069 = vmatpush1.bf16.msra.mxu0 %v2812_v26 }
  0x55   :  { %2071 = vmatprep.subr.bf16.mxu0 %v2816_v30 }
  0x56   :  { %2101 = vmatpush1.bf16.msra.mxu1 %v2833_v48 }
  0x57   :  { %2103 = vmatprep.subr.bf16.mxu1 %v2836_v52 }
  0x58   :  { %2073 = vmatpush1.bf16.msra.mxu0 %v2825_v42 }
  0x59   :  { %2075 = vmatprep.subr.bf16.mxu0 %v2830_v46 }
  0x5a   :  { %2105 = vmatpush1.bf16.msra.mxu1 %v2845_v62 }
  0x5b   :  { %2107 = vmatprep.subr.bf16.mxu1 %v2848_v1 }
  0x5c   :  { %2077 = vmatpush1.bf16.msra.mxu0 %v2839_v55 }
  0x5d   :  { %2079 = vmatprep.subr.bf16.mxu0 %v2842_v58 }
  0x5e   :  { %2109 = vmatpush1.bf16.msra.mxu1 %v2857_v15 }
  0x5f   :  { %2111 = vmatprep.subr.bf16.mxu1 %v2860_v18 }
  0x60   :  { %2081 = vmatpush1.bf16.msra.mxu0 %v2851_v7 }
  0x61   :  { %2083 = vmatprep.subr.bf16.mxu0 %v2854_v10 }
  0x62   :  { %2113 = vmatpush1.bf16.msra.mxu1 %v2869_v31 }
  0x63   :  { %2115 = vmatprep.subr.bf16.mxu1 %v2872_v32 }
  0x64   :  { %2085 = vmatpush1.bf16.msra.mxu0 %v2863_v24 }
  0x65   :  { %2087 = vmatprep.subr.bf16.mxu0 %v2866_v27 }
  0x66   :  { %2117 = vmatpush1.bf16.msra.mxu1 %v2879_v40 }
  0x67   :  { %2119 = vmatprep.subr.bf16.mxu1 %v2882_v41 }
  0x68   :  { %2089 = vmatpush1.bf16.msra.mxu0 %v2875_v39 }
  0x69   :  { %2123 = vmatprep.subr.bf16.mxu0 %v2794_v4 }
  0x6a   :  { %2121 = vmatpush1.bf16.msra.mxu1 %v2886_v47 }
  0x6b   :  { %2155 = vmatprep.subr.bf16.mxu1 %v2807_v22 }
 0x11e   :  { %v177_v51 = vpop.f32.mrb[0].mxu0 }
 0x11f   :  { %v178_v53 = vadd.f32 %v177_v51, %v107_v49  ;;  %v179_v54 = vpop.f32.mrb[1].mxu0 }
 0x120   :  { %v180_v56 = vadd.f32 %v179_v54, %v108_v50  ;;  %v248_v61 = vpop.f32.mrb[0].mxu1 }
 0x121   :  { %v1970_v57 = vmul.f32 -1.442695, %v178_v53  ;;  %v250_v63 = vpop.f32.mrb[1].mxu1  ;;  %v249_v6 = vadd.f32 %v248_v61, %v109_v3 }
 0x122   :  { %v1971_v59 = vmul.f32 -1.442695, %v180_v56  ;;  %v251_v2 = vadd.f32 %v250_v63, %v110_v60  ;;  %v346_v56 = vld [vmem:[#allocation2 + $0x38] sm:$0xff] }
 0x123   :  { %2515 = vpow2.f32 %v1970_v57  ;;  %v345_v57 = vld [vmem:[#allocation2 + $0x30] sm:$0xff] }
 0x124   :  { %2517 = vpow2.f32 %v1971_v59  ;;  %v1972_v5 = vmul.f32 -1.442695, %v251_v2 }
 0x126   :  { %2519 = vpow2.f32 %v1972_v5 }
 0x127   :  { %2521 = vtanh.f32 %v249_v6 }
 0x12d   :  { %v2516_v11 = vpop.eup %2515 }
 0x12e   :  { %v2518_v12 = vpop.eup %2517  ;;  %v256_v13 = vadd.f32 1.0, %v2516_v11 }
 0x12f   :  { %v262_v16 = vadd.f32 1.0, %v2518_v12 }
 0x130   :  { %2523 = vrcp.f32 %v256_v13  ;;  %v2520_v19 = vpop.eup %2519 }
 0x131   :  { %2525 = vrcp.f32 %v262_v16  ;;  %v2522_v20 = vpop.eup %2521  ;;  %v269_v23 = vadd.f32 1.0, %v2520_v19 }
 0x133   :  { %2527 = vrcp.f32 %v269_v23 }
 0x13a   :  { %v2524_v21 = vpop.eup %2523 }
 0x13b   :  { %v2526_v28 = vpop.eup %2525  ;;  %v273_v29 = vmul.f32 %v2524_v21, %v2522_v20 }
 0x13c   :  { %v272_v34 = vmul.f32 0.0, %v2526_v28  ;;  %v583_v28 = vld [vmem:[#allocation2 + $0x58] sm:$0xff] }
 0x13d   :  { %v2528_v36 = vpop.eup %2527 }
 0x13e   :  { %v2928_v35 = vadd.f32 %v273_v29, %v272_v34  ;;  %v582_v34 = vld [vmem:[#allocation2 + $0x50] sm:$0xff] }
 0x140   :  { %2529 = vtanh.f32 %v2928_v35 }
 0x14a   :  { %v2530_v38 = vpop.eup %2529 }
 0x14b   :  { %v276_v43 = vmul.f32 %v2530_v38, %v2528_v36 }
 0x14d   :  { %277 = vst [vmem:[#allocation7] sm:$0xff] %v276_v43  ;;  %412 = vmatmul.mubr.f32.vlgmr.msra.gmra.mrb[2].mxu0 %v276_v43  ;;  %483 = vmatmul.mubr.f32.vlgmr.msra.gmra.mrb[2].mxu1 %v276_v43 }
 0x14e   :  { %2125 = vmatpush1.bf16.msra.mxu0 %v2796_v8  ;;  %2157 = vmatpush1.bf16.msra.mxu1 %v2809_v25 }
 0x14f   :  { %2127 = vmatprep.subr.bf16.mxu0 %v2798_v9  ;;  %2159 = vmatprep.subr.bf16.mxu1 %v2819_v33 }
 0x150   :  { %648 = vmatprep.mubr.f32.mxu0 %v2743_v0  ;;  %719 = vmatprep.mubr.f32.mxu1 %v2743_v0 }
 0x152   :  { %2129 = vmatpush1.bf16.msra.mxu0 %v2802_v14  ;;  %2161 = vmatpush1.bf16.msra.mxu1 %v2821_v37 }
 0x153   :  { %2131 = vmatprep.subr.bf16.mxu0 %v2805_v17  ;;  %2163 = vmatprep.subr.bf16.mxu1 %v2827_v45 }
 0x156   :  { %2133 = vmatpush1.bf16.msra.mxu0 %v2812_v26  ;;  %2165 = vmatpush1.bf16.msra.mxu1 %v2833_v48 }
 0x157   :  { %2135 = vmatprep.subr.bf16.mxu0 %v2816_v30  ;;  %2167 = vmatprep.subr.bf16.mxu1 %v2836_v52 }
 0x15a   :  { %2137 = vmatpush1.bf16.msra.mxu0 %v2825_v42  ;;  %2169 = vmatpush1.bf16.msra.mxu1 %v2845_v62  ;;  %v343_v42 = vld [vmem:[#allocation2 + $0x20] sm:$0xff] }
 0x15b   :  { %2139 = vmatprep.subr.bf16.mxu0 %v2830_v46  ;;  %2171 = vmatprep.subr.bf16.mxu1 %v2848_v1 }
 0x15e   :  { %2141 = vmatpush1.bf16.msra.mxu0 %v2839_v55  ;;  %2173 = vmatpush1.bf16.msra.mxu1 %v2857_v15  ;;  %v344_v55 = vld [vmem:[#allocation2 + $0x28] sm:$0xff] }
 0x15f   :  { %2143 = vmatprep.subr.bf16.mxu0 %v2842_v58  ;;  %2175 = vmatprep.subr.bf16.mxu1 %v2860_v18 }
 0x162   :  { %2145 = vmatpush1.bf16.msra.mxu0 %v2851_v7  ;;  %2177 = vmatpush1.bf16.msra.mxu1 %v2869_v31 }
 0x163   :  { %2147 = vmatprep.subr.bf16.mxu0 %v2854_v10  ;;  %2179 = vmatprep.subr.bf16.mxu1 %v2872_v32 }
 0x166   :  { %2149 = vmatpush1.bf16.msra.mxu0 %v2863_v24  ;;  %2181 = vmatpush1.bf16.msra.mxu1 %v2879_v40 }
 0x167   :  { %2151 = vmatprep.subr.bf16.mxu0 %v2866_v27  ;;  %2183 = vmatprep.subr.bf16.mxu1 %v2882_v41 }
 0x16a   :  { %2153 = vmatpush1.bf16.msra.mxu0 %v2875_v39  ;;  %2185 = vmatpush1.bf16.msra.mxu1 %v2886_v47 }
 0x16b   :  { %2187 = vmatprep.subr.bf16.mxu0 %v2794_v4  ;;  %2219 = vmatprep.subr.bf16.mxu1 %v2807_v22 }
 0x220   :  { %v413_v7 = vpop.f32.mrb[2].mxu0  ;;  %v484_v44 = vpop.f32.mrb[2].mxu1 }
 0x221   :  { %v414_v49 = vadd.f32 %v413_v7, %v343_v42  ;;  %v415_v24 = vpop.f32.mrb[3].mxu0  ;;  %v486_v50 = vpop.f32.mrb[3].mxu1  ;;  %v485_v60 = vadd.f32 %v484_v44, %v345_v57  ;;  %v990_v57 = vld [vmem:[#allocation5 + $0x8] sm:$0xff] }
 0x222   :  { %v416_v51 = vadd.f32 %v415_v24, %v344_v55  ;;  %v487_v39 = vadd.f32 %v486_v50, %v346_v56 }
 0x223   :  { %v1973_v53 = vmul.f32 -1.442695, %v414_v49 }
 0x224   :  { %v1974_v54 = vmul.f32 -1.442695, %v416_v51  ;;  %v1975_v59 = vmul.f32 -1.442695, %v487_v39 }
 0x225   :  { %2531 = vpow2.f32 %v1973_v53 }
 0x226   :  { %2533 = vpow2.f32 %v1974_v54 }
 0x227   :  { %2535 = vpow2.f32 %v1975_v59  ;;  %v994_v59 = vld [vmem:[#allocation5 + $0x28] sm:$0xff] }
 0x228   :  { %2537 = vtanh.f32 %v485_v60  ;;  %v992_v60 = vld [vmem:[#allocation5 + $0x18] sm:$0xff] }
 0x22f   :  { %v2532_v4 = vpop.eup %2531 }
 0x230   :  { %v2534_v61 = vpop.eup %2533  ;;  %v492_v22 = vadd.f32 1.0, %v2532_v4  ;;  %v3017_v4 = vpack.c.bf16 %v994_v59, %v990_v57  ;;  %v1036_v59 = vld [vmem:[#allocation5 + $0x178] sm:$0xff] }
 0x231   :  { %v498_v63 = vadd.f32 1.0, %v2534_v61  ;;  %v2536_v2 = vpop.eup %2535  ;;  %v996_v61 = vld [vmem:[#allocation5 + $0x38] sm:$0xff] }
 0x232   :  { %2539 = vrcp.f32 %v492_v22  ;;  %v2538_v3 = vpop.eup %2537  ;;  %v505_v12 = vadd.f32 1.0, %v2536_v2  ;;  %v989_v22 = vld [vmem:[#allocation5] sm:$0xff]  ;;  %v3019_v2 = vpack.c.bf16 %v996_v61, %v992_v60  ;;  %v1031_v60 = vld [vmem:[#allocation5 + $0x150] sm:$0xff] }
 0x233   :  { %2541 = vrcp.f32 %v498_v63  ;;  %v993_v63 = vld [vmem:[#allocation5 + $0x20] sm:$0xff]  ;;  %v1035_v61 = vld [vmem:[#allocation5 + $0x170] sm:$0xff] }
 0x234   :  { %2543 = vrcp.f32 %v505_v12  ;;  %v998_v12 = vld [vmem:[#allocation5 + $0x48] sm:$0xff] }
 0x23c   :  { %v2540_v5 = vpop.eup %2539 }
 0x23d   :  { %v2542_v6 = vpop.eup %2541  ;;  %v509_v11 = vmul.f32 %v2540_v5, %v2538_v3  ;;  %v3021_v3 = vpack.c.bf16 %v993_v63, %v989_v22  ;;  %v991_v5 = vld [vmem:[#allocation5 + $0x10] sm:$0xff]  ;;  %v3077_v63 = vpack.c.bf16 %v1035_v61, %v1031_v60 }
 0x23e   :  { %v508_v13 = vmul.f32 %v2542_v6, %v2928_v35  ;;  %v2544_v19 = vpop.eup %2543  ;;  %v995_v6 = vld [vmem:[#allocation5 + $0x30] sm:$0xff] }
 0x240   :  { %v2966_v16 = vadd.f32 %v509_v11, %v508_v13  ;;  %v3024_v11 = vpack.c.bf16 %v995_v6, %v991_v5  ;;  %v1002_v13 = vld [vmem:[#allocation5 + $0x68] sm:$0xff] }
 0x241   :  { %v1038_v5 = vld [vmem:[#allocation5 + $0x188] sm:$0xff] }
 0x242   :  { %2545 = vtanh.f32 %v2966_v16  ;;  %v1042_v6 = vld [vmem:[#allocation5 + $0x1a8] sm:$0xff] }
 0x24c   :  { %v2546_v20 = vpop.eup %2545 }
 0x24d   :  { %v512_v21 = vmul.f32 %v2546_v20, %v2544_v19  ;;  %v3029_v19 = vpack.c.bf16 %v1002_v13, %v998_v12  ;;  %v1004_v20 = vld [vmem:[#allocation5 + $0x78] sm:$0xff]  ;;  %v3080_v13 = vpack.c.bf16 %v1042_v6, %v1038_v5 }
 0x24e   :  { %v1040_v12 = vld [vmem:[#allocation5 + $0x198] sm:$0xff] }
 0x24f   :  { %514 = vst [vmem:[#allocation7 + $0x8] sm:$0xff] %v512_v21  ;;  %649 = vmatmul.mubr.f32.vlgmr.msra.gmra.mrb[4].mxu0 %v512_v21  ;;  %720 = vmatmul.mubr.f32.vlgmr.msra.gmra.mrb[4].mxu1 %v512_v21  ;;  %v997_v21 = vld [vmem:[#allocation5 + $0x40] sm:$0xff] }
 0x250   :  { %2189 = vmatpush1.bf16.msra.mxu0 %v2796_v8  ;;  %2221 = vmatpush1.bf16.msra.mxu1 %v2809_v25  ;;  %v776_v8 = vld [vmem:[#allocation5 + $0xc0] sm:$0xff] }
 0x251   :  { %2191 = vmatprep.subr.bf16.mxu0 %v2798_v9  ;;  %2223 = vmatprep.subr.bf16.mxu1 %v2819_v33  ;;  %v780_v9 = vld [vmem:[#allocation5 + $0xe0] sm:$0xff] }
 0x252   :  { %885 = vmatprep.mubr.f32.mxu0 %v2743_v0  ;;  %956 = vmatprep.mubr.f32.mxu1 %v2743_v0  ;;  %v788_v25 = vld [vmem:[#allocation5 + $0x120] sm:$0xff] }
 0x253   :  { %v796_v33 = vld [vmem:[#allocation5 + $0x160] sm:$0xff] }
 0x254   :  { %2193 = vmatpush1.bf16.msra.mxu0 %v2802_v14  ;;  %2225 = vmatpush1.bf16.msra.mxu1 %v2821_v37  ;;  %v2992_v14 = vpack.c.bf16 %v780_v9, %v776_v8  ;;  %v1001_v8 = vld [vmem:[#allocation5 + $0x60] sm:$0xff] }
 0x255   :  { %2195 = vmatprep.subr.bf16.mxu0 %v2805_v17  ;;  %2227 = vmatprep.subr.bf16.mxu1 %v2827_v45  ;;  %v784_v17 = vld [vmem:[#allocation5 + $0x100] sm:$0xff] }
 0x256   :  { %v800_v45 = vld [vmem:[#allocation5 + $0x180] sm:$0xff] }
 0x258   :  { %2197 = vmatpush1.bf16.msra.mxu0 %v2812_v26  ;;  %2229 = vmatpush1.bf16.msra.mxu1 %v2833_v48  ;;  %v2996_v26 = vpack.c.bf16 %v788_v25, %v784_v17  ;;  %v804_v48 = vld [vmem:[#allocation5 + $0x1a0] sm:$0xff]  ;;  %v3033_v17 = vpack.c.bf16 %v1001_v8, %v997_v21  ;;  %v999_v25 = vld [vmem:[#allocation5 + $0x50] sm:$0xff] }
 0x259   :  { %2199 = vmatprep.subr.bf16.mxu0 %v2816_v30  ;;  %2231 = vmatprep.subr.bf16.mxu1 %v2836_v52  ;;  %v792_v30 = vld [vmem:[#allocation5 + $0x140] sm:$0xff]  ;;  %v3003_v52 = vpack.c.bf16 %v804_v48, %v800_v45  ;;  %v1006_v45 = vld [vmem:[#allocation5 + $0x88] sm:$0xff]  ;;  %v1043_v21 = vld [vmem:[#allocation5 + $0x1b0] sm:$0xff] }
 0x25a   :  { %v2999_v37 = vpack.c.bf16 %v796_v33, %v792_v30  ;;  %v1003_v30 = vld [vmem:[#allocation5 + $0x70] sm:$0xff]  ;;  %v1010_v48 = vld [vmem:[#allocation5 + $0xa8] sm:$0xff] }
 0x25b   :  { %v3036_v33 = vpack.c.bf16 %v1003_v30, %v999_v25  ;;  %v1046_v25 = vld [vmem:[#allocation5 + $0x1c8] sm:$0xff] }
 0x25c   :  { %2233 = vmatpush1.bf16.msra.mxu1 %v2845_v62  ;;  %2201 = vmatpush1.bf16.msra.mxu0 %v2992_v14  ;;  %v812_v62 = vld [vmem:[#allocation5 + $0x1e0] sm:$0xff]  ;;  %v1050_v30 = vld [vmem:[#allocation5 + $0x1e8] sm:$0xff] }
 0x25d   :  { %2235 = vmatprep.subr.bf16.mxu1 %v2848_v1  ;;  %2203 = vmatprep.subr.bf16.mxu0 %v2830_v46  ;;  %v808_v46 = vld [vmem:[#allocation5 + $0x1c0] sm:$0xff] }
 0x25e   :  { %v3007_v1 = vpack.c.bf16 %v812_v62, %v808_v46  ;;  %v1008_v46 = vld [vmem:[#allocation5 + $0x98] sm:$0xff]  ;;  %v3041_v62 = vpack.c.bf16 %v1010_v48, %v1006_v45 }
 0x25f   :  { %v1048_v45 = vld [vmem:[#allocation5 + $0x1d8] sm:$0xff] }
 0x260   :  { %2237 = vmatpush1.bf16.msra.mxu1 %v2857_v15  ;;  %2205 = vmatpush1.bf16.msra.mxu0 %v2996_v26  ;;  %v580_v15 = vld [vmem:[#allocation2 + $0x40] sm:$0xff]  ;;  %v1052_v48 = vld [vmem:[#allocation5 + $0x1f8] sm:$0xff] }
 0x261   :  { %2239 = vmatprep.subr.bf16.mxu1 %v2860_v18  ;;  %2207 = vmatprep.subr.bf16.mxu0 %v2842_v58  ;;  %v581_v58 = vld [vmem:[#allocation2 + $0x48] sm:$0xff] }
 0x264   :  { %2241 = vmatpush1.bf16.msra.mxu1 %v2869_v31  ;;  %2209 = vmatpush1.bf16.msra.mxu0 %v2999_v37 }
 0x265   :  { %2243 = vmatprep.subr.bf16.mxu1 %v2872_v32  ;;  %2211 = vmatprep.subr.bf16.mxu0 %v2854_v10 }
 0x268   :  { %2245 = vmatpush1.bf16.msra.mxu1 %v2879_v40  ;;  %2213 = vmatpush1.bf16.msra.mxu0 %v3003_v52 }
 0x269   :  { %2247 = vmatprep.subr.bf16.mxu1 %v2882_v41  ;;  %2215 = vmatprep.subr.bf16.mxu0 %v2866_v27 }
 0x26c   :  { %2249 = vmatpush1.bf16.msra.mxu1 %v2886_v47  ;;  %2217 = vmatpush1.bf16.msra.mxu0 %v3007_v1 }
 0x26d   :  { %2251 = vmatprep.subr.bf16.mxu0 %v3017_v4  ;;  %2283 = vmatprep.subr.bf16.mxu1 %v3019_v2 }
 0x322   :  { %v650_v18 = vpop.f32.mrb[4].mxu0  ;;  %v721_v31 = vpop.f32.mrb[4].mxu1 }
 0x323   :  { %v651_v32 = vadd.f32 %v650_v18, %v580_v15  ;;  %v652_v40 = vpop.f32.mrb[5].mxu0  ;;  %v723_v41 = vpop.f32.mrb[5].mxu1  ;;  %v722_v36 = vadd.f32 %v721_v31, %v582_v34  ;;  %v1012_v15 = vld [vmem:[#allocation5 + $0xb8] sm:$0xff]  ;;  %v1009_v18 = vld [vmem:[#allocation5 + $0xa0] sm:$0xff] }
 0x324   :  { %v653_v47 = vadd.f32 %v652_v40, %v581_v58  ;;  %v724_v29 = vadd.f32 %v723_v41, %v583_v28  ;;  %v1005_v58 = vld [vmem:[#allocation5 + $0x80] sm:$0xff]  ;;  %v3043_v31 = vpack.c.bf16 %v1012_v15, %v1008_v46  ;;  %v1007_v40 = vld [vmem:[#allocation5 + $0x90] sm:$0xff]  ;;  %v1016_v28 = vld [vmem:[#allocation5 + $0xd8] sm:$0xff]  ;;  %v3090_v15 = vpack.c.bf16 %v1050_v30, %v1046_v25 }
 0x325   :  { %v1976_v23 = vmul.f32 -1.442695, %v651_v32  ;;  %v3045_v32 = vpack.c.bf16 %v1009_v18, %v1005_v58  ;;  %v1011_v41 = vld [vmem:[#allocation5 + $0xb0] sm:$0xff]  ;;  %v1020_v34 = vld [vmem:[#allocation5 + $0xf8] sm:$0xff]  ;;  %v3093_v58 = vpack.c.bf16 %v1052_v48, %v1048_v45 }
 0x326   :  { %v1977_v10 = vmul.f32 -1.442695, %v653_v47  ;;  %v1978_v35 = vmul.f32 -1.442695, %v724_v29  ;;  %v3048_v47 = vpack.c.bf16 %v1011_v41, %v1007_v40  ;;  %v1047_v18 = vld [vmem:[#allocation5 + $0x1d0] sm:$0xff] }
 0x327   :  { %2547 = vpow2.f32 %v1976_v23  ;;  %v1014_v23 = vld [vmem:[#allocation5 + $0xc8] sm:$0xff]  ;;  %v1051_v40 = vld [vmem:[#allocation5 + $0x1f0] sm:$0xff] }
 0x328   :  { %2549 = vpow2.f32 %v1977_v10  ;;  %v1018_v10 = vld [vmem:[#allocation5 + $0xe8] sm:$0xff]  ;;  %v3098_v41 = vpack.c.bf16 %v1051_v40, %v1047_v18 }
 0x329   :  { %2551 = vpow2.f32 %v1978_v35  ;;  %v3053_v29 = vpack.c.bf16 %v1018_v10, %v1014_v23  ;;  %v1015_v35 = vld [vmem:[#allocation5 + $0xd0] sm:$0xff]  ;;  %v817_v23 = vld [vmem:[#allocation2 + $0x60] sm:$0xff]  ;;  %v818_v10 = vld [vmem:[#allocation2 + $0x68] sm:$0xff] }
 0x32a   :  { %2553 = vtanh.f32 %v722_v36  ;;  %v1019_v36 = vld [vmem:[#allocation5 + $0xf0] sm:$0xff] }
 0x331   :  { %v2548_v27 = vpop.eup %2547 }
 0x332   :  { %v2550_v38 = vpop.eup %2549  ;;  %v729_v43 = vadd.f32 1.0, %v2548_v27  ;;  %v3055_v27 = vpack.c.bf16 %v1020_v34, %v1016_v28 }
 0x333   :  { %v735_v42 = vadd.f32 1.0, %v2550_v38  ;;  %v2552_v55 = vpop.eup %2551  ;;  %v3057_v38 = vpack.c.bf16 %v1019_v36, %v1015_v35 }
 0x334   :  { %2555 = vrcp.f32 %v729_v43  ;;  %v2554_v7 = vpop.eup %2553  ;;  %v742_v50 = vadd.f32 1.0, %v2552_v55  ;;  %v1022_v43 = vld [vmem:[#allocation5 + $0x108] sm:$0xff]  ;;  %v1024_v55 = vld [vmem:[#allocation5 + $0x118] sm:$0xff] }
 0x335   :  { %2557 = vrcp.f32 %v735_v42  ;;  %v1026_v42 = vld [vmem:[#allocation5 + $0x128] sm:$0xff] }
 0x336   :  { %2559 = vrcp.f32 %v742_v50 }
 0x33e   :  { %v2556_v44 = vpop.eup %2555 }
 0x33f   :  { %v2558_v49 = vpop.eup %2557  ;;  %v746_v24 = vmul.f32 %v2556_v44, %v2554_v7  ;;  %v3063_v7 = vpack.c.bf16 %v1026_v42, %v1022_v43  ;;  %v1028_v44 = vld [vmem:[#allocation5 + $0x138] sm:$0xff] }
 0x340   :  { %v745_v51 = vmul.f32 %v2558_v49, %v2966_v16  ;;  %v2560_v54 = vpop.eup %2559  ;;  %v1000_v16 = vld [vmem:[#allocation5 + $0x58] sm:$0xff]  ;;  %v1023_v49 = vld [vmem:[#allocation5 + $0x110] sm:$0xff]  ;;  %v3065_v50 = vpack.c.bf16 %v1028_v44, %v1024_v55 }
 0x341   :  { %v3031_v9 = vpack.c.bf16 %v1004_v20, %v1000_v16  ;;  %v1044_v16 = vld [vmem:[#allocation5 + $0x1b8] sm:$0xff]  ;;  %v1039_v20 = vld [vmem:[#allocation5 + $0x190] sm:$0xff] }
 0x342   :  { %v3012_v53 = vadd.f32 %v746_v24, %v745_v51  ;;  %v1027_v24 = vld [vmem:[#allocation5 + $0x130] sm:$0xff]  ;;  %v3083_v8 = vpack.c.bf16 %v1044_v16, %v1040_v12  ;;  %v3088_v46 = vpack.c.bf16 %v1043_v21, %v1039_v20 }
 0x343   :  { %v3067_v51 = vpack.c.bf16 %v1027_v24, %v1023_v49  ;;  %v820_v49 = vld [vmem:[#allocation2 + $0x78] sm:$0xff] }
 0x344   :  { %2561 = vtanh.f32 %v3012_v53 }
 0x34e   :  { %v2562_v56 = vpop.eup %2561 }
 0x34f   :  { %v749_v39 = vmul.f32 %v2562_v56, %v2560_v54  ;;  %v1030_v54 = vld [vmem:[#allocation5 + $0x148] sm:$0xff] }
 0x350   :  { %v1034_v56 = vld [vmem:[#allocation5 + $0x168] sm:$0xff] }
 0x351   :  { %751 = vst [vmem:[#allocation7 + $0x10] sm:$0xff] %v749_v39  ;;  %886 = vmatmul.mubr.f32.vlgmr.msra.gmra.mrb[6].mxu0 %v749_v39  ;;  %957 = vmatmul.mubr.f32.vlgmr.msra.gmra.mrb[6].mxu1 %v749_v39  ;;  %v1032_v39 = vld [vmem:[#allocation5 + $0x158] sm:$0xff]  ;;  %v3072_v57 = vpack.c.bf16 %v1034_v56, %v1030_v54  ;;  %v819_v54 = vld [vmem:[#allocation2 + $0x70] sm:$0xff] }
 0x352   :  { %1122 = vmatprep.mubr.f32.mxu0 %v2743_v0  ;;  %1193 = vmatprep.mubr.f32.mxu1 %v2743_v0  ;;  %v3075_v22 = vpack.c.bf16 %v1036_v59, %v1032_v39 }
 0x353   :  { %2253 = vmatpush1.bf16.msra.mxu0 %v3021_v3  ;;  %2285 = vmatpush1.bf16.msra.mxu1 %v3024_v11 }
 0x354   :  { %2255 = vmatprep.subr.bf16.mxu0 %v3029_v19  ;;  %2287 = vmatprep.subr.bf16.mxu1 %v3031_v9 }
 0x357   :  { %2257 = vmatpush1.bf16.msra.mxu0 %v3033_v17  ;;  %2289 = vmatpush1.bf16.msra.mxu1 %v3036_v33 }
 0x358   :  { %2259 = vmatprep.subr.bf16.mxu0 %v3041_v62  ;;  %2291 = vmatprep.subr.bf16.mxu1 %v3043_v31 }
 0x35b   :  { %2261 = vmatpush1.bf16.msra.mxu0 %v3045_v32  ;;  %2293 = vmatpush1.bf16.msra.mxu1 %v3048_v47 }
 0x35c   :  { %2263 = vmatprep.subr.bf16.mxu0 %v3053_v29  ;;  %2295 = vmatprep.subr.bf16.mxu1 %v3055_v27 }
 0x35f   :  { %2265 = vmatpush1.bf16.msra.mxu0 %v2992_v14  ;;  %2297 = vmatpush1.bf16.msra.mxu1 %v3057_v38 }
 0x360   :  { %2267 = vmatprep.subr.bf16.mxu0 %v3063_v7  ;;  %2299 = vmatprep.subr.bf16.mxu1 %v3065_v50 }
 0x363   :  { %2269 = vmatpush1.bf16.msra.mxu0 %v2996_v26  ;;  %2301 = vmatpush1.bf16.msra.mxu1 %v3067_v51 }
 0x364   :  { %2271 = vmatprep.subr.bf16.mxu0 %v3072_v57  ;;  %2303 = vmatprep.subr.bf16.mxu1 %v3075_v22 }
 0x367   :  { %2273 = vmatpush1.bf16.msra.mxu0 %v2999_v37  ;;  %2305 = vmatpush1.bf16.msra.mxu1 %v3077_v63 }
 0x368   :  { %2275 = vmatprep.subr.bf16.mxu0 %v3080_v13  ;;  %2307 = vmatprep.subr.bf16.mxu1 %v3083_v8 }
 0x36b   :  { %2277 = vmatpush1.bf16.msra.mxu0 %v3003_v52  ;;  %2309 = vmatpush1.bf16.msra.mxu1 %v3088_v46 }
 0x36c   :  { %2279 = vmatprep.subr.bf16.mxu0 %v3090_v15  ;;  %2311 = vmatprep.subr.bf16.mxu1 %v3093_v58 }
 0x36f   :  { %2281 = vmatpush1.bf16.msra.mxu0 %v3007_v1  ;;  %2313 = vmatpush1.bf16.msra.mxu1 %v3098_v41 }
 0x370   :  { %2315 = vmatprep.subr.bf16.mxu0 %v3017_v4  ;;  %2347 = vmatprep.subr.bf16.mxu1 %v3019_v2 }
 0x424   :  { %v887_v28 = vpop.f32.mrb[6].mxu0  ;;  %v958_v34 = vpop.f32.mrb[6].mxu1 }
 0x425   :  { %v888_v35 = vadd.f32 %v887_v28, %v817_v23  ;;  %v889_v36 = vpop.f32.mrb[7].mxu0  ;;  %v960_v43 = vpop.f32.mrb[7].mxu1  ;;  %v959_v39 = vadd.f32 %v958_v34, %v819_v54  ;;  %v1055_v23 = vld [vmem:[#allocation2 + $0x88] sm:$0xff] }
 0x426   :  { %v890_v42 = vadd.f32 %v889_v36, %v818_v10  ;;  %v961_v24 = vadd.f32 %v960_v43, %v820_v49 }
 0x427   :  { %v1979_v55 = vmul.f32 -1.442695, %v888_v35 }
 0x428   :  { %v1980_v44 = vmul.f32 -1.442695, %v890_v42  ;;  %v1981_v56 = vmul.f32 -1.442695, %v961_v24  ;;  %v1056_v24 = vld [vmem:[#allocation2 + $0x90] sm:$0xff] }
 0x429   :  { %2563 = vpow2.f32 %v1979_v55 }
 0x42a   :  { %2565 = vpow2.f32 %v1980_v44  ;;  %v1057_v44 = vld [vmem:[#allocation2 + $0x98] sm:$0xff] }
 0x42b   :  { %2567 = vpow2.f32 %v1981_v56 }
 0x42c   :  { %2569 = vtanh.f32 %v959_v39 }
 0x433   :  { %v2564_v59 = vpop.eup %2563 }
 0x434   :  { %v2566_v60 = vpop.eup %2565  ;;  %v966_v61 = vadd.f32 1.0, %v2564_v59 }
 0x435   :  { %v972_v5 = vadd.f32 1.0, %v2566_v60  ;;  %v2568_v6 = vpop.eup %2567 }
 0x436   :  { %2571 = vrcp.f32 %v966_v61  ;;  %v2570_v12 = vpop.eup %2569  ;;  %v979_v25 = vadd.f32 1.0, %v2568_v6 }
 0x437   :  { %2573 = vrcp.f32 %v972_v5 }
 0x438   :  { %2575 = vrcp.f32 %v979_v25 }
 0x440   :  { %v2572_v16 = vpop.eup %2571 }
 0x441   :  { %v2574_v20 = vpop.eup %2573  ;;  %v983_v21 = vmul.f32 %v2572_v16, %v2570_v12 }
 0x442   :  { %v982_v30 = vmul.f32 %v2574_v20, %v3012_v53  ;;  %v2576_v48 = vpop.eup %2575  ;;  %v1054_v53 = vld [vmem:[#allocation2 + $0x80] sm:$0xff] }
 0x444   :  { %v3106_v45 = vadd.f32 %v983_v21, %v982_v30 }
 0x446   :  { %2577 = vtanh.f32 %v3106_v45 }
 0x450   :  { %v2578_v18 = vpop.eup %2577 }
 0x451   :  { %v986_v40 = vmul.f32 %v2578_v18, %v2576_v48 }
 0x453   :  { %988 = vst [vmem:[#allocation7 + $0x18] sm:$0xff] %v986_v40  ;;  %1123 = vmatmul.mubr.f32.vlgmr.msra.gmra.mrb[8].mxu0 %v986_v40  ;;  %1194 = vmatmul.mubr.f32.vlgmr.msra.gmra.mrb[8].mxu1 %v986_v40 }
 0x454   :  { %2317 = vmatpush1.bf16.msra.mxu0 %v3021_v3  ;;  %2349 = vmatpush1.bf16.msra.mxu1 %v3024_v11 }
 0x455   :  { %2319 = vmatprep.subr.bf16.mxu0 %v3029_v19  ;;  %2351 = vmatprep.subr.bf16.mxu1 %v3031_v9 }
 0x456   :  { %1359 = vmatprep.mubr.f32.mxu0 %v2743_v0  ;;  %1430 = vmatprep.mubr.f32.mxu1 %v2743_v0 }
 0x458   :  { %2321 = vmatpush1.bf16.msra.mxu0 %v3033_v17  ;;  %2353 = vmatpush1.bf16.msra.mxu1 %v3036_v33 }
 0x459   :  { %2323 = vmatprep.subr.bf16.mxu0 %v3041_v62  ;;  %2355 = vmatprep.subr.bf16.mxu1 %v3043_v31 }
 0x45c   :  { %2325 = vmatpush1.bf16.msra.mxu0 %v3045_v32  ;;  %2357 = vmatpush1.bf16.msra.mxu1 %v3048_v47 }
 0x45d   :  { %2327 = vmatprep.subr.bf16.mxu0 %v3053_v29  ;;  %2359 = vmatprep.subr.bf16.mxu1 %v3055_v27 }
 0x460   :  { %2329 = vmatpush1.bf16.msra.mxu0 %v2992_v14  ;;  %2361 = vmatpush1.bf16.msra.mxu1 %v3057_v38 }
 0x461   :  { %2331 = vmatprep.subr.bf16.mxu0 %v3063_v7  ;;  %2363 = vmatprep.subr.bf16.mxu1 %v3065_v50 }
 0x464   :  { %2333 = vmatpush1.bf16.msra.mxu0 %v2996_v26  ;;  %2365 = vmatpush1.bf16.msra.mxu1 %v3067_v51 }
 0x465   :  { %2335 = vmatprep.subr.bf16.mxu0 %v3072_v57  ;;  %2367 = vmatprep.subr.bf16.mxu1 %v3075_v22 }
 0x468   :  { %2337 = vmatpush1.bf16.msra.mxu0 %v2999_v37  ;;  %2369 = vmatpush1.bf16.msra.mxu1 %v3077_v63 }
 0x469   :  { %2339 = vmatprep.subr.bf16.mxu0 %v3080_v13  ;;  %2371 = vmatprep.subr.bf16.mxu1 %v3083_v8 }
 0x46c   :  { %2341 = vmatpush1.bf16.msra.mxu0 %v3003_v52  ;;  %2373 = vmatpush1.bf16.msra.mxu1 %v3088_v46 }
 0x46d   :  { %2343 = vmatprep.subr.bf16.mxu0 %v3090_v15  ;;  %2375 = vmatprep.subr.bf16.mxu1 %v3093_v58 }
 0x470   :  { %2345 = vmatpush1.bf16.msra.mxu0 %v3007_v1  ;;  %2377 = vmatpush1.bf16.msra.mxu1 %v3098_v41 }
 0x471   :  { %2379 = vmatprep.subr.bf16.mxu0 %v3017_v4  ;;  %2411 = vmatprep.subr.bf16.mxu1 %v3019_v2 }
 0x526   :  { %v1124_v10 = vpop.f32.mrb[8].mxu0  ;;  %v1195_v28 = vpop.f32.mrb[8].mxu1 }
 0x527   :  { %v1125_v34 = vadd.f32 %v1124_v10, %v1054_v53  ;;  %v1126_v35 = vpop.f32.mrb[9].mxu0  ;;  %v1197_v36 = vpop.f32.mrb[9].mxu1  ;;  %v1196_v56 = vadd.f32 %v1195_v28, %v1056_v24 }
 0x528   :  { %v1127_v43 = vadd.f32 %v1126_v35, %v1055_v23  ;;  %v1198_v49 = vadd.f32 %v1197_v36, %v1057_v44  ;;  %v1294_v35 = vld [vmem:[#allocation2 + $0xb8] sm:$0xff]  ;;  %v1293_v36 = vld [vmem:[#allocation2 + $0xb0] sm:$0xff] }
 0x529   :  { %v1982_v42 = vmul.f32 -1.442695, %v1125_v34 }
 0x52a   :  { %v1983_v55 = vmul.f32 -1.442695, %v1127_v43  ;;  %v1984_v54 = vmul.f32 -1.442695, %v1198_v49 }
 0x52b   :  { %2579 = vpow2.f32 %v1982_v42 }
 0x52c   :  { %2581 = vpow2.f32 %v1983_v55 }
 0x52d   :  { %2583 = vpow2.f32 %v1984_v54 }
 0x52e   :  { %2585 = vtanh.f32 %v1196_v56 }
 0x535   :  { %v2580_v39 = vpop.eup %2579 }
 0x536   :  { %v2582_v59 = vpop.eup %2581  ;;  %v1203_v60 = vadd.f32 1.0, %v2580_v39 }
 0x537   :  { %v1209_v61 = vadd.f32 1.0, %v2582_v59  ;;  %v2584_v5 = vpop.eup %2583 }
 0x538   :  { %2587 = vrcp.f32 %v1203_v60  ;;  %v2586_v6 = vpop.eup %2585  ;;  %v1216_v21 = vadd.f32 1.0, %v2584_v5 }
 0x539   :  { %2589 = vrcp.f32 %v1209_v61 }
 0x53a   :  { %2591 = vrcp.f32 %v1216_v21  ;;  %v1530_v21 = vld [vmem:[#allocation2 + $0xd0] sm:$0xff] }
 0x542   :  { %v2588_v12 = vpop.eup %2587 }
 0x543   :  { %v2590_v16 = vpop.eup %2589  ;;  %v1220_v20 = vmul.f32 %v2588_v12, %v2586_v6 }
 0x544   :  { %v1219_v25 = vmul.f32 %v2590_v16, %v3106_v45  ;;  %v2592_v48 = vpop.eup %2591 }
 0x546   :  { %v3144_v30 = vadd.f32 %v1220_v20, %v1219_v25  ;;  %v1531_v20 = vld [vmem:[#allocation2 + $0xd8] sm:$0xff] }
 0x548   :  { %2593 = vtanh.f32 %v3144_v30 }
 0x552   :  { %v2594_v18 = vpop.eup %2593 }
 0x553   :  { %v1223_v40 = vmul.f32 %v2594_v18, %v2592_v48 }
 0x555   :  { %1225 = vst [vmem:[#allocation7 + $0x20] sm:$0xff] %v1223_v40  ;;  %1360 = vmatmul.mubr.f32.vlgmr.msra.gmra.mrb[10].mxu0 %v1223_v40  ;;  %1431 = vmatmul.mubr.f32.vlgmr.msra.gmra.mrb[10].mxu1 %v1223_v40 }
 0x556   :  { %2381 = vmatpush1.bf16.msra.mxu0 %v3021_v3  ;;  %2413 = vmatpush1.bf16.msra.mxu1 %v3024_v11 }
 0x557   :  { %2383 = vmatprep.subr.bf16.mxu0 %v3029_v19  ;;  %2415 = vmatprep.subr.bf16.mxu1 %v3031_v9 }
 0x558   :  { %1596 = vmatprep.mubr.f32.mxu0 %v2743_v0  ;;  %1667 = vmatprep.mubr.f32.mxu1 %v2743_v0 }
 0x55a   :  { %2385 = vmatpush1.bf16.msra.mxu0 %v3033_v17  ;;  %2417 = vmatpush1.bf16.msra.mxu1 %v3036_v33 }
 0x55b   :  { %2387 = vmatprep.subr.bf16.mxu0 %v3041_v62  ;;  %2419 = vmatprep.subr.bf16.mxu1 %v3043_v31 }
 0x55e   :  { %2389 = vmatpush1.bf16.msra.mxu0 %v3045_v32  ;;  %2421 = vmatpush1.bf16.msra.mxu1 %v3048_v47 }
 0x55f   :  { %2391 = vmatprep.subr.bf16.mxu0 %v3053_v29  ;;  %2423 = vmatprep.subr.bf16.mxu1 %v3055_v27 }
 0x562   :  { %2393 = vmatpush1.bf16.msra.mxu0 %v2992_v14  ;;  %2425 = vmatpush1.bf16.msra.mxu1 %v3057_v38  ;;  %v1291_v14 = vld [vmem:[#allocation2 + $0xa0] sm:$0xff] }
 0x563   :  { %2395 = vmatprep.subr.bf16.mxu0 %v3063_v7  ;;  %2427 = vmatprep.subr.bf16.mxu1 %v3065_v50 }
 0x566   :  { %2397 = vmatpush1.bf16.msra.mxu0 %v2996_v26  ;;  %2429 = vmatpush1.bf16.msra.mxu1 %v3067_v51  ;;  %v1292_v26 = vld [vmem:[#allocation2 + $0xa8] sm:$0xff] }
 0x567   :  { %2399 = vmatprep.subr.bf16.mxu0 %v3072_v57  ;;  %2431 = vmatprep.subr.bf16.mxu1 %v3075_v22 }
 0x56a   :  { %2401 = vmatpush1.bf16.msra.mxu0 %v2999_v37  ;;  %2433 = vmatpush1.bf16.msra.mxu1 %v3077_v63 }
 0x56b   :  { %2403 = vmatprep.subr.bf16.mxu0 %v3080_v13  ;;  %2435 = vmatprep.subr.bf16.mxu1 %v3083_v8 }
 0x56e   :  { %2405 = vmatpush1.bf16.msra.mxu0 %v3003_v52  ;;  %2437 = vmatpush1.bf16.msra.mxu1 %v3088_v46 }
 0x56f   :  { %2407 = vmatprep.subr.bf16.mxu0 %v3090_v15  ;;  %2439 = vmatprep.subr.bf16.mxu1 %v3093_v58 }
 0x572   :  { %2409 = vmatpush1.bf16.msra.mxu0 %v3007_v1  ;;  %2441 = vmatpush1.bf16.msra.mxu1 %v3098_v41 }
 0x573   :  { %2443 = vmatprep.subr.bf16.mxu0 %v3017_v4  ;;  %2475 = vmatprep.subr.bf16.mxu1 %v3019_v2 }
 0x628   :  { %v1361_v37 = vpop.f32.mrb[10].mxu0  ;;  %v1432_v45 = vpop.f32.mrb[10].mxu1 }
 0x629   :  { %v1362_v53 = vadd.f32 %v1361_v37, %v1291_v14  ;;  %v1363_v52 = vpop.f32.mrb[11].mxu0  ;;  %v1434_v23 = vpop.f32.mrb[11].mxu1  ;;  %v1433_v42 = vadd.f32 %v1432_v45, %v1293_v36  ;;  %v1766_v36 = vld [vmem:[#allocation2 + $0xe8] sm:$0xff] }
 0x62a   :  { %v1364_v10 = vadd.f32 %v1363_v52, %v1292_v26  ;;  %v1435_v1 = vadd.f32 %v1434_v23, %v1294_v35 }
 0x62b   :  { %v1985_v28 = vmul.f32 -1.442695, %v1362_v53 }
 0x62c   :  { %v1986_v34 = vmul.f32 -1.442695, %v1364_v10  ;;  %v1987_v43 = vmul.f32 -1.442695, %v1435_v1  ;;  %v1765_v1 = vld [vmem:[#allocation2 + $0xe0] sm:$0xff] }
 0x62d   :  { %2595 = vpow2.f32 %v1985_v28 }
 0x62e   :  { %2597 = vpow2.f32 %v1986_v34 }
 0x62f   :  { %2599 = vpow2.f32 %v1987_v43 }
 0x630   :  { %2601 = vtanh.f32 %v1433_v42 }
 0x637   :  { %v2596_v4 = vpop.eup %2595 }
 0x638   :  { %v2598_v55 = vpop.eup %2597  ;;  %v1440_v2 = vadd.f32 1.0, %v2596_v4 }
 0x639   :  { %v1446_v44 = vadd.f32 1.0, %v2598_v55  ;;  %v2600_v49 = vpop.eup %2599 }
 0x63a   :  { %2603 = vrcp.f32 %v1440_v2  ;;  %v2602_v24 = vpop.eup %2601  ;;  %v1453_v59 = vadd.f32 1.0, %v2600_v49 }
 0x63b   :  { %2605 = vrcp.f32 %v1446_v44 }
 0x63c   :  { %2607 = vrcp.f32 %v1453_v59 }
 0x644   :  { %v2604_v54 = vpop.eup %2603 }
 0x645   :  { %v2606_v56 = vpop.eup %2605  ;;  %v1457_v39 = vmul.f32 %v2604_v54, %v2602_v24  ;;  %v1768_v54 = vld [vmem:[#allocation2 + $0xf8] sm:$0xff] }
 0x646   :  { %v1456_v60 = vmul.f32 %v2606_v56, %v3144_v30  ;;  %v2608_v5 = vpop.eup %2607 }
 0x648   :  { %v3182_v61 = vadd.f32 %v1457_v39, %v1456_v60  ;;  %v1767_v39 = vld [vmem:[#allocation2 + $0xf0] sm:$0xff] }
 0x64a   :  { %2609 = vtanh.f32 %v3182_v61 }
 0x654   :  { %v2610_v6 = vpop.eup %2609 }
 0x655   :  { %v1460_v12 = vmul.f32 %v2610_v6, %v2608_v5 }
 0x657   :  { %1462 = vst [vmem:[#allocation7 + $0x28] sm:$0xff] %v1460_v12  ;;  %1597 = vmatmul.mubr.f32.vlgmr.msra.gmra.mrb[12].mxu0 %v1460_v12  ;;  %1668 = vmatmul.mubr.f32.vlgmr.msra.gmra.mrb[12].mxu1 %v1460_v12 }
 0x658   :  { %2445 = vmatpush1.bf16.msra.mxu0 %v3021_v3  ;;  %2477 = vmatpush1.bf16.msra.mxu1 %v3024_v11  ;;  %v1728_v3 = vld [vmem:[#allocation5 + $0xe0] sm:$0xff] }
 0x659   :  { %2447 = vmatprep.subr.bf16.mxu0 %v3029_v19  ;;  %2479 = vmatprep.subr.bf16.mxu1 %v3031_v9  ;;  %v1732_v19 = vld [vmem:[#allocation5 + $0x100] sm:$0xff] }
 0x65a   :  { %1833 = vmatprep.mubr.f32.mxu0 %v2743_v0  ;;  %1904 = vmatprep.mubr.f32.mxu1 %v2743_v0  ;;  %v1724_v0 = vld [vmem:[#allocation5 + $0xc0] sm:$0xff] }
 0x65b   :  { %v2456_v11 = vpack.c.bf16 %v1728_v3, %v1724_v0  ;;  %v1736_v9 = vld [vmem:[#allocation5 + $0x120] sm:$0xff] }
 0x65c   :  { %2449 = vmatpush1.bf16.msra.mxu0 %v3033_v17  ;;  %2481 = vmatpush1.bf16.msra.mxu1 %v3036_v33  ;;  %v2460_v17 = vpack.c.bf16 %v1736_v9, %v1732_v19  ;;  %v1740_v33 = vld [vmem:[#allocation5 + $0x140] sm:$0xff] }
 0x65d   :  { %2451 = vmatprep.subr.bf16.mxu0 %v3041_v62  ;;  %2483 = vmatprep.subr.bf16.mxu1 %v3043_v31  ;;  %v1744_v62 = vld [vmem:[#allocation5 + $0x160] sm:$0xff] }
 0x65e   :  { %v2464_v31 = vpack.c.bf16 %v1744_v62, %v1740_v33 }
 0x660   :  { %2453 = vmatpush1.bf16.msra.mxu0 %v3045_v32  ;;  %2485 = vmatpush1.bf16.msra.mxu1 %v3048_v47  ;;  %v1748_v32 = vld [vmem:[#allocation5 + $0x180] sm:$0xff] }
 0x661   :  { %2455 = vmatprep.subr.bf16.mxu0 %v3053_v29  ;;  %2487 = vmatprep.subr.bf16.mxu1 %v3055_v27  ;;  %v1752_v47 = vld [vmem:[#allocation5 + $0x1a0] sm:$0xff] }
 0x662   :  { %v2468_v29 = vpack.c.bf16 %v1752_v47, %v1748_v32  ;;  %v1756_v27 = vld [vmem:[#allocation5 + $0x1c0] sm:$0xff] }
 0x664   :  { %2489 = vmatpush1.bf16.msra.mxu1 %v3057_v38  ;;  %2457 = vmatpush1.bf16.msra.mxu0 %v2456_v11  ;;  %v1760_v38 = vld [vmem:[#allocation5 + $0x1e0] sm:$0xff] }
 0x665   :  { %2491 = vmatprep.subr.bf16.mxu1 %v3065_v50  ;;  %2459 = vmatprep.subr.bf16.mxu0 %v3063_v7  ;;  %v2472_v50 = vpack.c.bf16 %v1760_v38, %v1756_v27  ;;  %v1528_v7 = vld [vmem:[#allocation2 + $0xc0] sm:$0xff] }
 0x668   :  { %2493 = vmatpush1.bf16.msra.mxu1 %v3067_v51  ;;  %2461 = vmatpush1.bf16.msra.mxu0 %v2460_v17  ;;  %v1529_v51 = vld [vmem:[#allocation2 + $0xc8] sm:$0xff] }
 0x669   :  { %2495 = vmatprep.subr.bf16.mxu1 %v3075_v22  ;;  %2463 = vmatprep.subr.bf16.mxu0 %v3072_v57 }
 0x66c   :  { %2497 = vmatpush1.bf16.msra.mxu1 %v3077_v63  ;;  %2465 = vmatpush1.bf16.msra.mxu0 %v2464_v31 }
 0x66d   :  { %2499 = vmatprep.subr.bf16.mxu1 %v3083_v8  ;;  %2467 = vmatprep.subr.bf16.mxu0 %v3080_v13 }
 0x670   :  { %2501 = vmatpush1.bf16.msra.mxu1 %v3088_v46  ;;  %2469 = vmatpush1.bf16.msra.mxu0 %v2468_v29 }
 0x671   :  { %2503 = vmatprep.subr.bf16.mxu1 %v3093_v58  ;;  %2471 = vmatprep.subr.bf16.mxu0 %v3090_v15 }
 0x674   :  { %2505 = vmatpush1.bf16.msra.mxu1 %v3098_v41  ;;  %2473 = vmatpush1.bf16.msra.mxu0 %v2472_v50 }
 0x72a   :  { %v1598_v22 = vpop.f32.mrb[12].mxu0  ;;  %v1669_v63 = vpop.f32.mrb[12].mxu1 }
 0x72b   :  { %v1599_v8 = vadd.f32 %v1598_v22, %v1528_v7  ;;  %v1600_v46 = vpop.f32.mrb[13].mxu0  ;;  %v1671_v57 = vpop.f32.mrb[13].mxu1  ;;  %v1670_v30 = vadd.f32 %v1669_v63, %v1530_v21 }
 0x72c   :  { %v1601_v58 = vadd.f32 %v1600_v46, %v1529_v51  ;;  %v1672_v13 = vadd.f32 %v1671_v57, %v1531_v20 }
 0x72d   :  { %v1988_v41 = vmul.f32 -1.442695, %v1599_v8 }
 0x72e   :  { %v1989_v16 = vmul.f32 -1.442695, %v1601_v58  ;;  %v1990_v25 = vmul.f32 -1.442695, %v1672_v13 }
 0x72f   :  { %2611 = vpow2.f32 %v1988_v41 }
 0x730   :  { %2613 = vpow2.f32 %v1989_v16 }
 0x731   :  { %2615 = vpow2.f32 %v1990_v25 }
 0x732   :  { %2617 = vtanh.f32 %v1670_v30 }
 0x739   :  { %v2612_v48 = vpop.eup %2611 }
 0x73a   :  { %v2614_v15 = vpop.eup %2613  ;;  %v1677_v18 = vadd.f32 1.0, %v2612_v48 }
 0x73b   :  { %v1683_v40 = vadd.f32 1.0, %v2614_v15  ;;  %v2616_v14 = vpop.eup %2615 }
 0x73c   :  { %2619 = vrcp.f32 %v1677_v18  ;;  %v2618_v26 = vpop.eup %2617  ;;  %v1690_v52 = vadd.f32 1.0, %v2616_v14 }
 0x73d   :  { %2621 = vrcp.f32 %v1683_v40 }
 0x73e   :  { %2623 = vrcp.f32 %v1690_v52 }
 0x746   :  { %v2620_v37 = vpop.eup %2619 }
 0x747   :  { %v2622_v45 = vpop.eup %2621  ;;  %v1694_v53 = vmul.f32 %v2620_v37, %v2618_v26 }
 0x748   :  { %v1693_v23 = vmul.f32 %v2622_v45, %v3182_v61  ;;  %v2624_v28 = vpop.eup %2623 }
 0x74a   :  { %v1695_v10 = vadd.f32 %v1694_v53, %v1693_v23 }
 0x74c   :  { %2625 = vtanh.f32 %v1695_v10 }
 0x756   :  { %v2626_v34 = vpop.eup %2625 }
 0x757   :  { %v1697_v35 = vmul.f32 %v2626_v34, %v2624_v28 }
 0x759   :  { %1699 = vst [vmem:[#allocation7 + $0x30] sm:$0xff] %v1697_v35  ;;  %1834 = vmatmul.mubr.f32.vlgmr.msra.gmra.mrb[14].mxu0 %v1697_v35  ;;  %1905 = vmatmul.mubr.f32.vlgmr.msra.gmra.mrb[14].mxu1 %v1697_v35 }
 0x82c   :  { %v1835_v43 = vpop.f32.mrb[14].mxu0  ;;  %v1906_v42 = vpop.f32.mrb[14].mxu1 }
 0x82d   :  { %v1836_v4 = vadd.f32 %v1835_v43, %v1765_v1  ;;  %v1837_v55 = vpop.f32.mrb[15].mxu0  ;;  %v1908_v2 = vpop.f32.mrb[15].mxu1  ;;  %v1907_v60 = vadd.f32 %v1906_v42, %v1767_v39 }
 0x82e   :  { %v1838_v44 = vadd.f32 %v1837_v55, %v1766_v36  ;;  %v1909_v56 = vadd.f32 %v1908_v2, %v1768_v54 }
 0x82f   :  { %v1991_v49 = vmul.f32 -1.442695, %v1836_v4 }
 0x830   :  { %v1992_v24 = vmul.f32 -1.442695, %v1838_v44  ;;  %v1993_v59 = vmul.f32 -1.442695, %v1909_v56 }
 0x831   :  { %2627 = vpow2.f32 %v1991_v49 }
 0x832   :  { %2629 = vpow2.f32 %v1992_v24 }
 0x833   :  { %2631 = vpow2.f32 %v1993_v59 }
 0x834   :  { %2633 = vtanh.f32 %v1907_v60 }
 0x83b   :  { %v2628_v61 = vpop.eup %2627 }
 0x83c   :  { %v2630_v5 = vpop.eup %2629  ;;  %v1914_v6 = vadd.f32 1.0, %v2628_v61 }
 0x83d   :  { %v1920_v12 = vadd.f32 1.0, %v2630_v5  ;;  %v2632_v0 = vpop.eup %2631 }
 0x83e   :  { %2635 = vrcp.f32 %v1914_v6  ;;  %v2634_v3 = vpop.eup %2633  ;;  %v1927_v17 = vadd.f32 1.0, %v2632_v0 }
 0x83f   :  { %2637 = vrcp.f32 %v1920_v12 }
 0x840   :  { %2639 = vrcp.f32 %v1927_v17 }
 0x848   :  { %v2636_v11 = vpop.eup %2635 }
 0x849   :  { %v2638_v19 = vpop.eup %2637  ;;  %v1931_v9 = vmul.f32 %v2636_v11, %v2634_v3 }
 0x84a   :  { %v1930_v33 = vmul.f32 %v2638_v19, %v1695_v10 }
 0x84c   :  { %v1932_v62 = vadd.f32 %v1931_v9, %v1930_v33 }
 0x84e   :  { %2641 = vtanh.f32 %v1932_v62  ;;  %1937 = vst [vmem:[#allocation8] sm:$0xff] %v1932_v62 }
 0x84f   :  { %2698 = shalt.err (!%p2695_p6)
}
 0x850   :  { %s2699_s14 = scalar_lea.hbm %s3240_s3, 128 }
 0x851   :  { %p2700_p7 = scmp.ne.s32.totalorder %s3240_s3, %s2699_s14  ;;  %p2703_p8 = scmp.lt.u32.totalorder %s2699_s14, %s3240_s3 }
 0x853   :  { %p2705_p9 = pnand %p2703_p8, %p2700_p7 }
 0x855   :  { %2708 = shalt.err (!%p2705_p9)
}
 0x856   :  { %1959 = dma.vmem_to_hbm [thread:$0]  %s1957_s10, 128, %s3240_s3, [#allocation9]   ;;  %v2640_v31 = vpop.eup %2639 }
 0x857   :  { %s2745_s21 = smov [#allocation7]  }
 0x858   :  { %s1943_s22 = sshll.u32 %s2745_s21, 4  ;;  %v2642_v32 = vpop.eup %2641  ;;  %s1944_s22 = int_to_ptr.vmem [resolvable:$true] %s1943_s22 }
 0x859   :  { %v1934_v47 = vmul.f32 %v2642_v32, %v2640_v31  ;;  %s2709_s23 = scalar_lea.vmem %s1944_s22, 1024  ;;  %p2714_p11 = scmp.lt.s32.totalorder %s1944_s22, %s1944_s22 }
 0x85a   :  { %p2710_p10 = scmp.ne.s32.totalorder %s1944_s22, %s2709_s23  ;;  %p2715_p12 = scmp.lt.s32.totalorder %s2709_s23, %s2709_s23 }
 0x85b   :  { %1936 = vst [vmem:[#allocation7 + $0x38] sm:$0xff] %v1934_v47 }
 0x85c   :  { %p2716_p13 = por %p2715_p12, %p2714_p11 }
 0x85e   :  { %p2717_p0 = pnand %p2716_p13, %p2710_p10 }
 0x860   :  { %2720 = shalt.err (!%p2717_p0)
}
 0x861   :  { %s2721_s26 = scalar_lea.hbm %s3239_s2, 1024 }
 0x862   :  { %p2722_p1 = scmp.ne.s32.totalorder %s3239_s2, %s2721_s26  ;;  %p2725_p2 = scmp.lt.u32.totalorder %s2721_s26, %s3239_s2 }
 0x864   :  { %p2727_p3 = pnand %p2725_p2, %p2722_p1 }
 0x866   :  { %2730 = shalt.err (!%p2727_p3)
}
 0x867   :  { %s2746_s30 = smov 128   ;;  %s2747_s4 = smov 8  }
 0x868   :  { %1949 = dma.vmem_to_hbm [thread:$0]  %s1944_s22, 1024, %s3239_s2, [#allocation4], %s2746_s30, %s2746_s30, %s2747_s4  }
 0x869   :  { %2735 = dma.done.wait [#allocation4], 1024  }
 0x86a   :  { %2736 = vsyncadd [#allocation4], 4294966272 }
 0x86b   :  { %2737 = dma.done.wait [#allocation9], 128  }
 0x86c   :  { %2738 = vsyncadd [#allocation9], 4294967168 }
 0x86d   :  { %1966 = vsyncpa [#allocation3], 1 }
 0x86e   :  { %1967 = vsyncpa [#allocation6], 1 }
 0x86f   :  { %1968 = vsyncpa [#allocation4], 1 }
 0x870   :  { %1969 = vsyncpa [#allocation9], 1 }

</bundles_post_ra>
